<compile_context>
chip_gen: v7x
topology: tpu7x:2x2x1
jax: 0.10.0
libtpu: 0.0.40
codegen_flags: <defaults>
</compile_context>

<pallas_src>
import functools

import jax
import jax.numpy as jnp
from jax.experimental import pallas as pl
from jax.experimental.pallas import tpu as pltpu  # noqa: F401

D_MODEL = 32
NHEAD = 4
DIM_FF = 64
SEQ_TGT = 8      # decoder (query) length
SEQ_MEM = 16     # encoder memory length
BATCH = 2
LN_EPS = 1e-5


def _layer_norm(x, gamma, beta):
    mu = jnp.mean(x, axis=-1, keepdims=True)
    var = jnp.mean((x - mu) ** 2, axis=-1, keepdims=True)
    return (x - mu) * jax.lax.rsqrt(var + LN_EPS) * gamma + beta


def decoder_layer_kernel(act_ref, wself_ref, w64_ref, w32_ref, out_ref,
                         *, nhead, batch, s_tgt, s_mem):
    D = out_ref.shape[-1]
    hd = D // nhead
    scale = 1.0 / float(hd) ** 0.5
    nt = batch * s_tgt
    nm = batch * s_mem

    # ---- activations (one packed slab, row offsets are multiples of 8) ----
    xa = act_ref[0:nt, :]           # (nt, 2D)  [tgt | query_pos]
    ma = act_ref[nt:nt + nm, :]     # (nm, 2D)  [memory | pos]
    x = xa[:, 0:D]                  # (nt, D)   tgt (residual / V input)

    # ---- row-packed weight slabs (all row offsets sublane-aligned) ----
    w_s_o = w32_ref[0:D, :]              # (D, D)
    w_c_q = w32_ref[D:2 * D, :]          # (D, D)
    w_c_o = w32_ref[2 * D:3 * D, :]      # (D, D)
    w2 = w32_ref[3 * D:5 * D, :]         # (2D, D)
    hones = w32_ref[5 * D:6 * D, :]      # (D, D)  block-diagonal head-ones
    vec = w32_ref[6 * D:6 * D + 9, :]    # (9, D)  biases + LayerNorm params
    b_s_o, b_c_o, b2 = vec[0:1], vec[1:2], vec[2:3]
    ln1_g, ln1_b = vec[3:4], vec[4:5]
    ln2_g, ln2_b = vec[5:6], vec[6:7]
    ln3_g, ln3_b = vec[7:8], vec[8:9]

    def attention(q, k, v, sq, sk):
        # q: (batch*sq, D), k/v: (batch*sk, D); heads live in lane groups of hd.
        q4 = (q * scale).reshape(batch, sq, D)[:, :, None, :]    # (b, sq, 1, D)
        k4 = k.reshape(batch, 1, sk, D)                          # (b, 1, sk, D)
        prod = q4 * k4                                           # (b, sq, sk, D)
        # per-head score, replicated across each head's hd lanes (one matmul,
        # heads never leave the lane dimension)
        s = jnp.dot(prod.reshape(batch * sq * sk, D), hones,
                    preferred_element_type=jnp.float32
                    ).reshape(batch, sq, sk, D)
        s = s - jnp.max(s, axis=2, keepdims=True)                # keys = sublanes
        p = jnp.exp(s)
        p = p / jnp.sum(p, axis=2, keepdims=True)                # exact softmax
        ctx = jnp.sum(p * v.reshape(batch, 1, sk, D), axis=2)    # (b, sq, D)
        return ctx.reshape(batch * sq, D)

    # ---- self-attention + norm1 ----
    # [tgt|qpos] @ [[wq wk wv 0],[wq wk 0 w_c_q]] + bias -> q | k | v | qpos@w_c_q
    P = jnp.dot(xa, wself_ref[0:2 * D, :],
                preferred_element_type=jnp.float32) + wself_ref[2 * D:2 * D + 1, :]
    q_s, k_s, v_s = P[:, 0:D], P[:, D:2 * D], P[:, 2 * D:3 * D]
    qc_pos = P[:, 3 * D:4 * D]        # query_pos @ w_c_q + b_c_q (reused below)
    sa = jnp.dot(attention(q_s, k_s, v_s, s_tgt, s_tgt), w_s_o,
                 preferred_element_type=jnp.float32) + b_s_o
    t1 = _layer_norm(x + sa, ln1_g, ln1_b)

    # ---- cross-attention + norm2 ----
    # [memory|pos] @ [[wk wv],[wk 0]] + bias -> k | v
    KV = jnp.dot(ma, w64_ref[0:2 * D, :],
                 preferred_element_type=jnp.float32) + w64_ref[2 * D:2 * D + 1, :]
    k_c, v_c = KV[:, 0:D], KV[:, D:2 * D]
    q_c = jnp.dot(t1, w_c_q, preferred_element_type=jnp.float32) + qc_pos
    ca = jnp.dot(attention(q_c, k_c, v_c, s_tgt, s_mem), w_c_o,
                 preferred_element_type=jnp.float32) + b_c_o
    t2 = _layer_norm(t1 + ca, ln2_g, ln2_b)

    # ---- feed forward + norm3 ----
    ff_row = ((2 * D + 1 + 7) // 8) * 8          # sublane-aligned linear1 block
    w1 = w64_ref[ff_row:ff_row + D, :]           # (D, F)
    b1 = w64_ref[ff_row + D:ff_row + D + 1, :]   # (1, F)
    h = jnp.maximum(jnp.dot(t2, w1, preferred_element_type=jnp.float32) + b1, 0.0)
    ff = jnp.dot(h, w2, preferred_element_type=jnp.float32) + b2
    t3 = _layer_norm(t2 + ff, ln3_g, ln3_b)

    out_ref[...] = t3.astype(out_ref.dtype)


def pack_params(p):
    """Pack weights/biases/LN params into 3 row-major slabs. Call ONCE at init."""
    D, F = D_MODEL, DIM_FF
    hd = D // NHEAD
    z = jnp.zeros((D, D), jnp.float32)

    # (2D+1, 4D): rows 0:D act on tgt, rows D:2D on query_pos, row 2D = bias.
    # Output columns: [ self Q | self K | self V | query_pos @ cross-Wq ].
    w_self = jnp.concatenate([
        jnp.concatenate([p["s_wq"], p["s_wk"], p["s_wv"], z], axis=1),
        jnp.concatenate([p["s_wq"], p["s_wk"], z, p["c_wq"]], axis=1),
        jnp.concatenate([p["s_bq"], p["s_bk"], p["s_bv"], p["c_bq"]])[None, :],
    ], axis=0)

    # cross-attn fused K|V over [memory|pos] + FFN linear1, all 2D (=F) wide.
    assert DIM_FF == 2 * D_MODEL, "w64 slab packing assumes dim_feedforward == 2*d_model"
    ff_row = ((2 * D + 1 + 7) // 8) * 8
    pad = jnp.zeros((ff_row - (2 * D + 1), F), jnp.float32)
    w64 = jnp.concatenate([
        jnp.concatenate([p["c_wk"], p["c_wv"]], axis=1),    # rows 0:D   (memory)
        jnp.concatenate([p["c_wk"], z], axis=1),            # rows D:2D  (pos)
        jnp.concatenate([p["c_bk"], p["c_bv"]])[None, :],   # row  2D    (bias)
        pad,
        p["w1"],                                            # rows ff_row:ff_row+D
        p["b1"][None, :],                                   # row  ff_row+D
    ], axis=0)

    # (6D+9, D): row-packed square weights, head mask, bias / LN vectors.
    head = jnp.arange(D) // hd
    hones = (head[:, None] == head[None, :]).astype(jnp.float32)
    vec = jnp.stack([p["s_bo"], p["c_bo"], p["b2"],
                     p["ln1_g"], p["ln1_b"], p["ln2_g"], p["ln2_b"],
                     p["ln3_g"], p["ln3_b"]], axis=0)
    w32 = jnp.concatenate([p["s_wo"], p["c_wq"], p["c_wo"], p["w2"], hones, vec],
                          axis=0)
    return {"w_self": w_self, "w64": w64, "w32": w32}


@jax.jit
def transformer_decoder_layer(tgt, memory, query_pos, pos, packed):
    """tgt/query_pos: (St, B, D); memory/pos: (Sm, B, D). Returns (St, B, D)."""
    St, B, D = tgt.shape
    Sm = memory.shape[0]
    flat = lambda a: jnp.transpose(a, (1, 0, 2)).reshape(B * a.shape[0], D)
    # One activation DMA: [tgt|query_pos] rows then [memory|pos] rows.
    acts = jnp.concatenate([
        jnp.concatenate([flat(tgt), flat(query_pos)], axis=1),
        jnp.concatenate([flat(memory), flat(pos)], axis=1),
    ], axis=0)
    kernel = functools.partial(decoder_layer_kernel, nhead=NHEAD, batch=B,
                               s_tgt=St, s_mem=Sm)
    out2d = pl.pallas_call(
        kernel,
        out_shape=jax.ShapeDtypeStruct((B * St, D), tgt.dtype),
    )(acts, packed["w_self"], packed["w64"], packed["w32"])
    return jnp.transpose(out2d.reshape(B, St, D), (1, 0, 2))


def reference(tgt, memory, query_pos, pos, p):
    """Pure-JAX reference of TransformerDecoderLayer.forward_post (eval mode)."""
    St, B, D = tgt.shape
    hd = D // NHEAD

    def mha(q_in, k_in, v_in, wq, bq, wk, bk, wv, bv, wo, bo):
        Sq, Sk = q_in.shape[0], k_in.shape[0]
        q = (q_in @ wq + bq).reshape(Sq, B, NHEAD, hd).transpose(1, 2, 0, 3)
        k = (k_in @ wk + bk).reshape(Sk, B, NHEAD, hd).transpose(1, 2, 0, 3)
        v = (v_in @ wv + bv).reshape(Sk, B, NHEAD, hd).transpose(1, 2, 0, 3)
        s = jnp.einsum("bhqd,bhkd->bhqk", q * (hd ** -0.5), k)
        a = jax.nn.softmax(s, axis=-1)
        ctx = jnp.einsum("bhqk,bhkd->bhqd", a, v).transpose(2, 0, 1, 3).reshape(Sq, B, D)
        return ctx @ wo + bo

    t = tgt.astype(jnp.float32)
    m = memory.astype(jnp.float32)
    qp = query_pos.astype(jnp.float32)
    mp = pos.astype(jnp.float32)

    sa = mha(t + qp, t + qp, t,
             p["s_wq"], p["s_bq"], p["s_wk"], p["s_bk"],
             p["s_wv"], p["s_bv"], p["s_wo"], p["s_bo"])
    t = _layer_norm(t + sa, p["ln1_g"], p["ln1_b"])
    ca = mha(t + qp, m + mp, m,
             p["c_wq"], p["c_bq"], p["c_wk"], p["c_bk"],
             p["c_wv"], p["c_bv"], p["c_wo"], p["c_bo"])
    t = _layer_norm(t + ca, p["ln2_g"], p["ln2_b"])
    ff = jnp.maximum(t @ p["w1"] + p["b1"], 0.0) @ p["w2"] + p["b2"]
    return _layer_norm(t + ff, p["ln3_g"], p["ln3_b"])


def init_params(key):
    D, F = D_MODEL, DIM_FF
    ks = iter(jax.random.split(key, 32))
    n = lambda shape, s=0.1: s * jax.random.normal(next(ks), shape, jnp.float32)
    return {
        # weights stored as (in, out), i.e. transposed vs torch's (out, in)
        "s_wq": n((D, D)), "s_bq": n((D,)),
        "s_wk": n((D, D)), "s_bk": n((D,)),
        "s_wv": n((D, D)), "s_bv": n((D,)),
        "s_wo": n((D, D)), "s_bo": n((D,)),
        "c_wq": n((D, D)), "c_bq": n((D,)),
        "c_wk": n((D, D)), "c_bk": n((D,)),
        "c_wv": n((D, D)), "c_bv": n((D,)),
        "c_wo": n((D, D)), "c_bo": n((D,)),
        "w1": n((D, F)), "b1": n((F,)),
        "w2": n((F, D)), "b2": n((D,)),
        "ln1_g": 1.0 + n((D,)), "ln1_b": n((D,)),
        "ln2_g": 1.0 + n((D,)), "ln2_b": n((D,)),
        "ln3_g": 1.0 + n((D,)), "ln3_b": n((D,)),
    }


if __name__ == "__main__":
    key = jax.random.PRNGKey(0)
    k1, k2, k3, k4, k5 = jax.random.split(key, 5)
    tgt = jax.random.normal(k1, (SEQ_TGT, BATCH, D_MODEL), jnp.float32)
    query_pos = jax.random.normal(k2, (SEQ_TGT, BATCH, D_MODEL), jnp.float32)
    memory = jax.random.normal(k3, (SEQ_MEM, BATCH, D_MODEL), jnp.float32)
    pos = jax.random.normal(k4, (SEQ_MEM, BATCH, D_MODEL), jnp.float32)
    params = init_params(k5)
    packed = pack_params(params)   # hoisted: packed once, reused every forward

    out = jax.block_until_ready(
        transformer_decoder_layer(tgt, memory, query_pos, pos, packed))
    ref = jax.block_until_ready(reference(tgt, memory, query_pos, pos, params))

    assert out.shape == (SEQ_TGT, BATCH, D_MODEL)
    # Exact softmax normalisation -> tolerance tightened from 5e-3 to 1e-4.
    assert jnp.allclose(out, ref, rtol=1e-4, atol=1e-4), (
        "mismatch vs reference: max abs diff "
        f"{float(jnp.max(jnp.abs(out - ref)))}")
    print("KERNEL_OK")
</pallas_src>

<mosaic_0001>
module attributes {stable_mosaic.version = 11 : i64} {
  func.func @decoder_layer_kernel(%arg0: memref<48x64xf32, #tpu.memory_space<vmem>>, %arg1: memref<65x128xf32, #tpu.memory_space<vmem>>, %arg2: memref<105x64xf32, #tpu.memory_space<vmem>>, %arg3: memref<201x32xf32, #tpu.memory_space<vmem>>, %arg4: memref<16x32xf32, #tpu.memory_space<vmem>>) attributes {dimension_semantics = [], scalar_prefetch = 0 : i64, scratch_operands = 0 : i64, tpu.core_type = #tpu.core_type<tc>} {
    %c0 = arith.constant 0 : index
    %c0_0 = arith.constant 0 : index
    %0 = vector.load %arg0[%c0, %c0_0] : memref<48x64xf32, #tpu.memory_space<vmem>>, vector<16x64xf32>
    %c16 = arith.constant 16 : index
    %c0_1 = arith.constant 0 : index
    %1 = vector.load %arg0[%c16, %c0_1] : memref<48x64xf32, #tpu.memory_space<vmem>>, vector<32x64xf32>
    %2 = vector.extract_strided_slice %0 {offsets = [0, 0], sizes = [16, 32], strides = [1, 1]} : vector<16x64xf32> to vector<16x32xf32>
    %c0_2 = arith.constant 0 : index
    %c0_3 = arith.constant 0 : index
    %3 = vector.load %arg3[%c0_2, %c0_3] : memref<201x32xf32, #tpu.memory_space<vmem>>, vector<32x32xf32>
    %c32 = arith.constant 32 : index
    %c0_4 = arith.constant 0 : index
    %4 = vector.load %arg3[%c32, %c0_4] : memref<201x32xf32, #tpu.memory_space<vmem>>, vector<32x32xf32>
    %c64 = arith.constant 64 : index
    %c0_5 = arith.constant 0 : index
    %5 = vector.load %arg3[%c64, %c0_5] : memref<201x32xf32, #tpu.memory_space<vmem>>, vector<32x32xf32>
    %c96 = arith.constant 96 : index
    %c0_6 = arith.constant 0 : index
    %6 = vector.load %arg3[%c96, %c0_6] : memref<201x32xf32, #tpu.memory_space<vmem>>, vector<64x32xf32>
    %c160 = arith.constant 160 : index
    %c0_7 = arith.constant 0 : index
    %7 = vector.load %arg3[%c160, %c0_7] : memref<201x32xf32, #tpu.memory_space<vmem>>, vector<32x32xf32>
    %c192 = arith.constant 192 : index
    %c0_8 = arith.constant 0 : index
    %8 = vector.load %arg3[%c192, %c0_8] : memref<201x32xf32, #tpu.memory_space<vmem>>, vector<9x32xf32>
    %9 = vector.extract_strided_slice %8 {offsets = [0, 0], sizes = [1, 32], strides = [1, 1]} : vector<9x32xf32> to vector<1x32xf32>
    %10 = vector.extract_strided_slice %8 {offsets = [1, 0], sizes = [1, 32], strides = [1, 1]} : vector<9x32xf32> to vector<1x32xf32>
    %11 = vector.extract_strided_slice %8 {offsets = [2, 0], sizes = [1, 32], strides = [1, 1]} : vector<9x32xf32> to vector<1x32xf32>
    %12 = vector.extract_strided_slice %8 {offsets = [3, 0], sizes = [1, 32], strides = [1, 1]} : vector<9x32xf32> to vector<1x32xf32>
    %13 = vector.extract_strided_slice %8 {offsets = [4, 0], sizes = [1, 32], strides = [1, 1]} : vector<9x32xf32> to vector<1x32xf32>
    %14 = vector.extract_strided_slice %8 {offsets = [5, 0], sizes = [1, 32], strides = [1, 1]} : vector<9x32xf32> to vector<1x32xf32>
    %15 = vector.extract_strided_slice %8 {offsets = [6, 0], sizes = [1, 32], strides = [1, 1]} : vector<9x32xf32> to vector<1x32xf32>
    %16 = vector.extract_strided_slice %8 {offsets = [7, 0], sizes = [1, 32], strides = [1, 1]} : vector<9x32xf32> to vector<1x32xf32>
    %17 = vector.extract_strided_slice %8 {offsets = [8, 0], sizes = [1, 32], strides = [1, 1]} : vector<9x32xf32> to vector<1x32xf32>
    %c0_9 = arith.constant 0 : index
    %c0_10 = arith.constant 0 : index
    %18 = vector.load %arg1[%c0_9, %c0_10] : memref<65x128xf32, #tpu.memory_space<vmem>>, vector<64x128xf32>
    %cst = arith.constant dense<0.000000e+00> : vector<16x128xf32>
    %19 = tpu.matmul %0, %18, %cst {dimension_numbers = #tpu.dot_dimension_numbers<[1], [0], [0], [1], [0, 0, 1, 1], [], []>} : vector<16x64xf32>, vector<64x128xf32>, vector<16x128xf32> -> vector<16x128xf32>
    %c64_11 = arith.constant 64 : index
    %c0_12 = arith.constant 0 : index
    %20 = vector.load %arg1[%c64_11, %c0_12] : memref<65x128xf32, #tpu.memory_space<vmem>>, vector<1x128xf32>
    %21 = vector.broadcast %20 : vector<1x128xf32> to vector<16x128xf32>
    %22 = arith.addf %19, %21 : vector<16x128xf32>
    %23 = vector.extract_strided_slice %22 {offsets = [0, 0], sizes = [16, 32], strides = [1, 1]} : vector<16x128xf32> to vector<16x32xf32>
    %24 = vector.extract_strided_slice %22 {offsets = [0, 32], sizes = [16, 32], strides = [1, 1]} : vector<16x128xf32> to vector<16x32xf32>
    %25 = vector.extract_strided_slice %22 {offsets = [0, 64], sizes = [16, 32], strides = [1, 1]} : vector<16x128xf32> to vector<16x32xf32>
    %26 = vector.extract_strided_slice %22 {offsets = [0, 96], sizes = [16, 32], strides = [1, 1]} : vector<16x128xf32> to vector<16x32xf32>
    %cst_13 = arith.constant 0.353553385 : f32
    %27 = vector.broadcast %cst_13 : f32 to vector<16x32xf32>
    %28 = arith.mulf %23, %27 : vector<16x32xf32>
    %29 = vector.shape_cast %28 : vector<16x32xf32> to vector<2x8x32xf32>
    %30 = vector.shape_cast %29 : vector<2x8x32xf32> to vector<2x8x1x32xf32>
    %31 = vector.shape_cast %24 : vector<16x32xf32> to vector<2x1x8x32xf32>
    %32 = vector.broadcast %30 : vector<2x8x1x32xf32> to vector<2x8x8x32xf32>
    %33 = vector.broadcast %31 : vector<2x1x8x32xf32> to vector<2x8x8x32xf32>
    %34 = arith.mulf %32, %33 : vector<2x8x8x32xf32>
    %35 = vector.shape_cast %34 : vector<2x8x8x32xf32> to vector<128x32xf32>
    %cst_14 = arith.constant dense<0.000000e+00> : vector<128x32xf32>
    %36 = tpu.matmul %35, %7, %cst_14 {dimension_numbers = #tpu.dot_dimension_numbers<[1], [0], [0], [1], [0, 0, 1, 1], [], []>} : vector<128x32xf32>, vector<32x32xf32>, vector<128x32xf32> -> vector<128x32xf32>
    %37 = vector.shape_cast %36 : vector<128x32xf32> to vector<2x8x8x32xf32>
    %cst_15 = arith.constant dense<0xFF800000> : vector<2x8x32xf32>
    %38 = vector.multi_reduction <maximumf>, %37, %cst_15 [2] : vector<2x8x8x32xf32> to vector<2x8x32xf32>
    %39 = vector.shape_cast %38 : vector<2x8x32xf32> to vector<2x8x1x32xf32>
    %40 = vector.broadcast %39 : vector<2x8x1x32xf32> to vector<2x8x8x32xf32>
    %41 = arith.subf %37, %40 : vector<2x8x8x32xf32>
    %42 = math.exp %41 : vector<2x8x8x32xf32>
    %cst_16 = arith.constant dense<0.000000e+00> : vector<2x8x32xf32>
    %43 = vector.multi_reduction <add>, %42, %cst_16 [2] : vector<2x8x8x32xf32> to vector<2x8x32xf32>
    %44 = vector.shape_cast %43 : vector<2x8x32xf32> to vector<2x8x1x32xf32>
    %45 = vector.broadcast %44 : vector<2x8x1x32xf32> to vector<2x8x8x32xf32>
    %46 = arith.divf %42, %45 : vector<2x8x8x32xf32>
    %47 = vector.shape_cast %25 : vector<16x32xf32> to vector<2x1x8x32xf32>
    %48 = vector.broadcast %47 : vector<2x1x8x32xf32> to vector<2x8x8x32xf32>
    %49 = arith.mulf %46, %48 : vector<2x8x8x32xf32>
    %cst_17 = arith.constant dense<0.000000e+00> : vector<2x8x32xf32>
    %50 = vector.multi_reduction <add>, %49, %cst_17 [2] : vector<2x8x8x32xf32> to vector<2x8x32xf32>
    %51 = vector.shape_cast %50 : vector<2x8x32xf32> to vector<16x32xf32>
    %cst_18 = arith.constant dense<0.000000e+00> : vector<16x32xf32>
    %52 = tpu.matmul %51, %3, %cst_18 {dimension_numbers = #tpu.dot_dimension_numbers<[1], [0], [0], [1], [0, 0, 1, 1], [], []>} : vector<16x32xf32>, vector<32x32xf32>, vector<16x32xf32> -> vector<16x32xf32>
    %53 = vector.broadcast %9 : vector<1x32xf32> to vector<16x32xf32>
    %54 = arith.addf %52, %53 : vector<16x32xf32>
    %55 = arith.addf %2, %54 : vector<16x32xf32>
    %cst_19 = arith.constant dense<0.000000e+00> : vector<16xf32>
    %56 = vector.multi_reduction <add>, %55, %cst_19 [1] : vector<16x32xf32> to vector<16xf32>
    %57 = vector.shape_cast %56 : vector<16xf32> to vector<16x1xf32>
    %cst_20 = arith.constant 3.200000e+01 : f32
    %58 = vector.broadcast %cst_20 : f32 to vector<16x1xf32>
    %59 = arith.divf %57, %58 : vector<16x1xf32>
    %60 = vector.broadcast %59 : vector<16x1xf32> to vector<16x32xf32>
    %61 = arith.subf %55, %60 : vector<16x32xf32>
    %62 = arith.mulf %61, %61 : vector<16x32xf32>
    %cst_21 = arith.constant dense<0.000000e+00> : vector<16xf32>
    %63 = vector.multi_reduction <add>, %62, %cst_21 [1] : vector<16x32xf32> to vector<16xf32>
    %64 = vector.shape_cast %63 : vector<16xf32> to vector<16x1xf32>
    %cst_22 = arith.constant 3.200000e+01 : f32
    %65 = vector.broadcast %cst_22 : f32 to vector<16x1xf32>
    %66 = arith.divf %64, %65 : vector<16x1xf32>
    %67 = vector.broadcast %59 : vector<16x1xf32> to vector<16x32xf32>
    %68 = arith.subf %55, %67 : vector<16x32xf32>
    %cst_23 = arith.constant 9.99999974E-6 : f32
    %69 = vector.broadcast %cst_23 : f32 to vector<16x1xf32>
    %70 = arith.addf %66, %69 : vector<16x1xf32>
    %71 = math.rsqrt %70 : vector<16x1xf32>
    %72 = vector.broadcast %71 : vector<16x1xf32> to vector<16x32xf32>
    %73 = arith.mulf %68, %72 : vector<16x32xf32>
    %74 = vector.broadcast %12 : vector<1x32xf32> to vector<16x32xf32>
    %75 = arith.mulf %73, %74 : vector<16x32xf32>
    %76 = vector.broadcast %13 : vector<1x32xf32> to vector<16x32xf32>
    %77 = arith.addf %75, %76 : vector<16x32xf32>
    %c0_24 = arith.constant 0 : index
    %c0_25 = arith.constant 0 : index
    %78 = vector.load %arg2[%c0_24, %c0_25] : memref<105x64xf32, #tpu.memory_space<vmem>>, vector<64x64xf32>
    %cst_26 = arith.constant dense<0.000000e+00> : vector<32x64xf32>
    %79 = tpu.matmul %1, %78, %cst_26 {dimension_numbers = #tpu.dot_dimension_numbers<[1], [0], [0], [1], [0, 0, 1, 1], [], []>} : vector<32x64xf32>, vector<64x64xf32>, vector<32x64xf32> -> vector<32x64xf32>
    %c64_27 = arith.constant 64 : index
    %c0_28 = arith.constant 0 : index
    %80 = vector.load %arg2[%c64_27, %c0_28] : memref<105x64xf32, #tpu.memory_space<vmem>>, vector<1x64xf32>
    %81 = vector.broadcast %80 : vector<1x64xf32> to vector<32x64xf32>
    %82 = arith.addf %79, %81 : vector<32x64xf32>
    %83 = vector.extract_strided_slice %82 {offsets = [0, 0], sizes = [32, 32], strides = [1, 1]} : vector<32x64xf32> to vector<32x32xf32>
    %84 = vector.extract_strided_slice %82 {offsets = [0, 32], sizes = [32, 32], strides = [1, 1]} : vector<32x64xf32> to vector<32x32xf32>
    %cst_29 = arith.constant dense<0.000000e+00> : vector<16x32xf32>
    %85 = tpu.matmul %77, %4, %cst_29 {dimension_numbers = #tpu.dot_dimension_numbers<[1], [0], [0], [1], [0, 0, 1, 1], [], []>} : vector<16x32xf32>, vector<32x32xf32>, vector<16x32xf32> -> vector<16x32xf32>
    %86 = arith.addf %85, %26 : vector<16x32xf32>
    %cst_30 = arith.constant 0.353553385 : f32
    %87 = vector.broadcast %cst_30 : f32 to vector<16x32xf32>
    %88 = arith.mulf %86, %87 : vector<16x32xf32>
    %89 = vector.shape_cast %88 : vector<16x32xf32> to vector<2x8x32xf32>
    %90 = vector.shape_cast %89 : vector<2x8x32xf32> to vector<2x8x1x32xf32>
    %91 = vector.shape_cast %83 : vector<32x32xf32> to vector<2x1x16x32xf32>
    %92 = vector.broadcast %90 : vector<2x8x1x32xf32> to vector<2x8x16x32xf32>
    %93 = vector.broadcast %91 : vector<2x1x16x32xf32> to vector<2x8x16x32xf32>
    %94 = arith.mulf %92, %93 : vector<2x8x16x32xf32>
    %95 = vector.shape_cast %94 : vector<2x8x16x32xf32> to vector<256x32xf32>
    %cst_31 = arith.constant dense<0.000000e+00> : vector<256x32xf32>
    %96 = tpu.matmul %95, %7, %cst_31 {dimension_numbers = #tpu.dot_dimension_numbers<[1], [0], [0], [1], [0, 0, 1, 1], [], []>} : vector<256x32xf32>, vector<32x32xf32>, vector<256x32xf32> -> vector<256x32xf32>
    %97 = vector.shape_cast %96 : vector<256x32xf32> to vector<2x8x16x32xf32>
    %cst_32 = arith.constant dense<0xFF800000> : vector<2x8x32xf32>
    %98 = vector.multi_reduction <maximumf>, %97, %cst_32 [2] : vector<2x8x16x32xf32> to vector<2x8x32xf32>
    %99 = vector.shape_cast %98 : vector<2x8x32xf32> to vector<2x8x1x32xf32>
    %100 = vector.broadcast %99 : vector<2x8x1x32xf32> to vector<2x8x16x32xf32>
    %101 = arith.subf %97, %100 : vector<2x8x16x32xf32>
    %102 = math.exp %101 : vector<2x8x16x32xf32>
    %cst_33 = arith.constant dense<0.000000e+00> : vector<2x8x32xf32>
    %103 = vector.multi_reduction <add>, %102, %cst_33 [2] : vector<2x8x16x32xf32> to vector<2x8x32xf32>
    %104 = vector.shape_cast %103 : vector<2x8x32xf32> to vector<2x8x1x32xf32>
    %105 = vector.broadcast %104 : vector<2x8x1x32xf32> to vector<2x8x16x32xf32>
    %106 = arith.divf %102, %105 : vector<2x8x16x32xf32>
    %107 = vector.shape_cast %84 : vector<32x32xf32> to vector<2x1x16x32xf32>
    %108 = vector.broadcast %107 : vector<2x1x16x32xf32> to vector<2x8x16x32xf32>
    %109 = arith.mulf %106, %108 : vector<2x8x16x32xf32>
    %cst_34 = arith.constant dense<0.000000e+00> : vector<2x8x32xf32>
    %110 = vector.multi_reduction <add>, %109, %cst_34 [2] : vector<2x8x16x32xf32> to vector<2x8x32xf32>
    %111 = vector.shape_cast %110 : vector<2x8x32xf32> to vector<16x32xf32>
    %cst_35 = arith.constant dense<0.000000e+00> : vector<16x32xf32>
    %112 = tpu.matmul %111, %5, %cst_35 {dimension_numbers = #tpu.dot_dimension_numbers<[1], [0], [0], [1], [0, 0, 1, 1], [], []>} : vector<16x32xf32>, vector<32x32xf32>, vector<16x32xf32> -> vector<16x32xf32>
    %113 = vector.broadcast %10 : vector<1x32xf32> to vector<16x32xf32>
    %114 = arith.addf %112, %113 : vector<16x32xf32>
    %115 = arith.addf %77, %114 : vector<16x32xf32>
    %cst_36 = arith.constant dense<0.000000e+00> : vector<16xf32>
    %116 = vector.multi_reduction <add>, %115, %cst_36 [1] : vector<16x32xf32> to vector<16xf32>
    %117 = vector.shape_cast %116 : vector<16xf32> to vector<16x1xf32>
    %cst_37 = arith.constant 3.200000e+01 : f32
    %118 = vector.broadcast %cst_37 : f32 to vector<16x1xf32>
    %119 = arith.divf %117, %118 : vector<16x1xf32>
    %120 = vector.broadcast %119 : vector<16x1xf32> to vector<16x32xf32>
    %121 = arith.subf %115, %120 : vector<16x32xf32>
    %122 = arith.mulf %121, %121 : vector<16x32xf32>
    %cst_38 = arith.constant dense<0.000000e+00> : vector<16xf32>
    %123 = vector.multi_reduction <add>, %122, %cst_38 [1] : vector<16x32xf32> to vector<16xf32>
    %124 = vector.shape_cast %123 : vector<16xf32> to vector<16x1xf32>
    %cst_39 = arith.constant 3.200000e+01 : f32
    %125 = vector.broadcast %cst_39 : f32 to vector<16x1xf32>
    %126 = arith.divf %124, %125 : vector<16x1xf32>
    %127 = vector.broadcast %119 : vector<16x1xf32> to vector<16x32xf32>
    %128 = arith.subf %115, %127 : vector<16x32xf32>
    %cst_40 = arith.constant 9.99999974E-6 : f32
    %129 = vector.broadcast %cst_40 : f32 to vector<16x1xf32>
    %130 = arith.addf %126, %129 : vector<16x1xf32>
    %131 = math.rsqrt %130 : vector<16x1xf32>
    %132 = vector.broadcast %131 : vector<16x1xf32> to vector<16x32xf32>
    %133 = arith.mulf %128, %132 : vector<16x32xf32>
    %134 = vector.broadcast %14 : vector<1x32xf32> to vector<16x32xf32>
    %135 = arith.mulf %133, %134 : vector<16x32xf32>
    %136 = vector.broadcast %15 : vector<1x32xf32> to vector<16x32xf32>
    %137 = arith.addf %135, %136 : vector<16x32xf32>
    %c72 = arith.constant 72 : index
    %c0_41 = arith.constant 0 : index
    %138 = vector.load %arg2[%c72, %c0_41] : memref<105x64xf32, #tpu.memory_space<vmem>>, vector<32x64xf32>
    %c104 = arith.constant 104 : index
    %c0_42 = arith.constant 0 : index
    %139 = vector.load %arg2[%c104, %c0_42] : memref<105x64xf32, #tpu.memory_space<vmem>>, vector<1x64xf32>
    %cst_43 = arith.constant dense<0.000000e+00> : vector<16x64xf32>
    %140 = tpu.matmul %137, %138, %cst_43 {dimension_numbers = #tpu.dot_dimension_numbers<[1], [0], [0], [1], [0, 0, 1, 1], [], []>} : vector<16x32xf32>, vector<32x64xf32>, vector<16x64xf32> -> vector<16x64xf32>
    %141 = vector.broadcast %139 : vector<1x64xf32> to vector<16x64xf32>
    %142 = arith.addf %140, %141 : vector<16x64xf32>
    %cst_44 = arith.constant 0.000000e+00 : f32
    %143 = vector.broadcast %cst_44 : f32 to vector<16x64xf32>
    %144 = arith.maximumf %142, %143 : vector<16x64xf32>
    %cst_45 = arith.constant dense<0.000000e+00> : vector<16x32xf32>
    %145 = tpu.matmul %144, %6, %cst_45 {dimension_numbers = #tpu.dot_dimension_numbers<[1], [0], [0], [1], [0, 0, 1, 1], [], []>} : vector<16x64xf32>, vector<64x32xf32>, vector<16x32xf32> -> vector<16x32xf32>
    %146 = vector.broadcast %11 : vector<1x32xf32> to vector<16x32xf32>
    %147 = arith.addf %145, %146 : vector<16x32xf32>
    %148 = arith.addf %137, %147 : vector<16x32xf32>
    %cst_46 = arith.constant dense<0.000000e+00> : vector<16xf32>
    %149 = vector.multi_reduction <add>, %148, %cst_46 [1] : vector<16x32xf32> to vector<16xf32>
    %150 = vector.shape_cast %149 : vector<16xf32> to vector<16x1xf32>
    %cst_47 = arith.constant 3.200000e+01 : f32
    %151 = vector.broadcast %cst_47 : f32 to vector<16x1xf32>
    %152 = arith.divf %150, %151 : vector<16x1xf32>
    %153 = vector.broadcast %152 : vector<16x1xf32> to vector<16x32xf32>
    %154 = arith.subf %148, %153 : vector<16x32xf32>
    %155 = arith.mulf %154, %154 : vector<16x32xf32>
    %cst_48 = arith.constant dense<0.000000e+00> : vector<16xf32>
    %156 = vector.multi_reduction <add>, %155, %cst_48 [1] : vector<16x32xf32> to vector<16xf32>
    %157 = vector.shape_cast %156 : vector<16xf32> to vector<16x1xf32>
    %cst_49 = arith.constant 3.200000e+01 : f32
    %158 = vector.broadcast %cst_49 : f32 to vector<16x1xf32>
    %159 = arith.divf %157, %158 : vector<16x1xf32>
    %160 = vector.broadcast %152 : vector<16x1xf32> to vector<16x32xf32>
    %161 = arith.subf %148, %160 : vector<16x32xf32>
    %cst_50 = arith.constant 9.99999974E-6 : f32
    %162 = vector.broadcast %cst_50 : f32 to vector<16x1xf32>
    %163 = arith.addf %159, %162 : vector<16x1xf32>
    %164 = math.rsqrt %163 : vector<16x1xf32>
    %165 = vector.broadcast %164 : vector<16x1xf32> to vector<16x32xf32>
    %166 = arith.mulf %161, %165 : vector<16x32xf32>
    %167 = vector.broadcast %16 : vector<1x32xf32> to vector<16x32xf32>
    %168 = arith.mulf %166, %167 : vector<16x32xf32>
    %169 = vector.broadcast %17 : vector<1x32xf32> to vector<16x32xf32>
    %170 = arith.addf %168, %169 : vector<16x32xf32>
    %c0_51 = arith.constant 0 : index
    %c0_52 = arith.constant 0 : index
    %171 = vector.load %arg4[%c0_51, %c0_52] : memref<16x32xf32, #tpu.memory_space<vmem>>, vector<16x32xf32>
    tpu.vector_store %arg4[%c0_51, %c0_52], %170 {strides = array<i32>} : memref<16x32xf32, #tpu.memory_space<vmem>>, vector<16x32xf32>,
    return
  }
}

</mosaic_0001>

<bundles_post_ra>
// kernel: transformer_decoder_layer.1
= control target key start
LH: loop header
LB: loop body
LE: loop exit
PB: predicated region body
PF: predicated region fallthrough
CT: control target
= control target key end

     0   :  { %vm62_vm0 = vcmask 523264   ;;  %s3522_s19 = smov 64   ;;  %s3523_s20 = smov 96   ;;  %v3524_v25 = vmov 1966171168   ;;  %v152_v27 = vlaneseq  ;;  %vm350_vm1 = vcmask 261120   ;;  %s4675_s1 = inlined_call_operand.vmem [shape: f32[65,128], index: 1, kind: input, shape index: {}]   ;;  %s4676_s0 = inlined_call_operand.vmem [shape: f32[48,64], index: 0, kind: input, shape index: {}]   ;;  %s4677_s3 = inlined_call_operand.vmem [shape: f32[201,32], index: 3, kind: input, shape index: {}]   ;;  %s4678_s2 = inlined_call_operand.vmem [shape: f32[105,64], index: 2, kind: input, shape index: {}]   ;;  %s4679_s4 = inlined_call_operand.vmem [shape: f32[16,32], index: 4, kind: output, shape index: {}]  }
   0x1   :  { %v49_v0 = vld [vmem:[%s4675_s1] sm:$0xff]  ;;  %v50_v1 = vld [vmem:[%s4675_s1 + $0x8] sm:$0xff]  ;;  %v51_v2 = vld [vmem:[%s4675_s1 + $0x10] sm:$0xff]  ;;  %v150_v26 = vunpack.c.l.s4 %v3524_v25  ;;  %vm1002_vm2 = vcmask 1041409   ;;  %vm1004_vm3 = vcmask 1042434   ;;  %vm1006_vm4 = vcmask 1043459  }
   0x2   :  { %v3247_v3 = vpack.c.bf16 %v50_v1, %v49_v0  ;;  %v52_v4 = vld [vmem:[%s4675_s1 + $0x18] sm:$0xff]  ;;  %v53_v6 = vld [vmem:[%s4675_s1 + $0x20] sm:$0xff]  ;;  %v54_v7 = vld [vmem:[%s4675_s1 + $0x28] sm:$0xff]  ;;  %v3616_v29 = vshrl.u32 %v152_v27, 7  ;;  %vm1008_vm5 = vcmask 1044484   ;;  %vm1010_vm6 = vcmask 1045509  }
   0x3   :  { %v3251_v5 = vpack.c.bf16 %v52_v4, %v51_v2  ;;  %v17_v8 = vld [vmem:[%s4676_s0] sm:$0xff]  ;;  %v3255_v9 = vpack.c.bf16 %v54_v7, %v53_v6  ;;  %v55_v10 = vld [vmem:[%s4675_s1 + $0x30] sm:$0xff]  ;;  %v56_v11 = vld [vmem:[%s4675_s1 + $0x38] sm:$0xff]  ;;  %v151_v28 = vunpack.c.0.s8 %v150_v26  ;;  %vm1012_vm7 = vcmask 1046534   ;;  %s3525_s8 = smov 32  }
   0x4   :  { %3248 = vmatprep.subr.bf16.mxu1 %v3247_v3  ;;  %3071 = vmatprep.mubr.msk.f32.mxu1 %vm62_vm0, %v17_v8  ;;  %v3259_v12 = vpack.c.bf16 %v56_v11, %v55_v10  ;;  %v18_v13 = vld [vmem:[%s4676_s0 + $0x8] sm:$0xff]  ;;  %v43_v14 = vld [vmem:[%s4677_s3 + $0xa0] sm:$0xff]  ;;  %v45_v16 = vld [vmem:[%s4677_s3 + $0xb0] sm:$0xff]  ;;  %v3626_v37 = vsub.s32 0, %v3616_v29  ;;  %vm1014_vm8 = vcmask 1047559  }
   0x5   :  { %3250 = vmatpush3.bf16.msra.mxu1 %v3247_v3  ;;  %v44_v15 = vld [vmem:[%s4677_s3 + $0xa8] sm:$0xff]  ;;  %v46_v18 = vld [vmem:[%s4677_s3 + $0xb8] sm:$0xff]  ;;  %v2875_v20 = vld [vmem:[%s4675_s1 + $0x40] ss:$0 sm:$0xff]  ;;  %v3619_v30 = vsub.s32 %v151_v28, %v3616_v29 }
   0x6   :  { %3252 = vmatprep.subr.bf16.mxu1 %v3251_v5  ;;  %v3592_v17 = vpack.c.bf16 %v44_v15, %v43_v14  ;;  %v3597_v19 = vpack.c.bf16 %v46_v18, %v45_v16 }
   0x9   :  { %3254 = vmatpush3.bf16.msra.mxu1 %v3251_v5 }
   0xa   :  { %3256 = vmatprep.subr.bf16.mxu1 %v3255_v9 }
   0xd   :  { %3258 = vmatpush3.bf16.msra.mxu1 %v3255_v9 }
   0xe   :  { %3260 = vmatprep.subr.bf16.mxu1 %v3259_v12 }
  0x11   :  { %3262 = vmatpush3.bf16.msra.mxu1 %v3259_v12 }
  0x12   :  { %3264 = vmatprep.subr.bf16.mxu1 %v3592_v17 }
  0x14   :  { %3072 = vmatmul.mubr.msk.f32.vlgmr.msra.gmra.mrb[0].mxu1 %vm62_vm0, %v18_v13 }
  0x15   :  { %3266 = vmatpush3.bf16.msra.mxu1 %v3592_v17 }
  0x16   :  { %3268 = vmatprep.subr.bf16.mxu1 %v3597_v19 }
  0x19   :  { %3270 = vmatpush3.bf16.msra.mxu1 %v3597_v19 }
  0xe7   :  { %v3073_v21 = vpop.f32.mrb[0].mxu1 }
  0xe8   :  { %v135_v22 = vpop.f32.mrb[1].mxu1  ;;  %v3611_v24 = vadd.f32 %v3073_v21, %v2875_v20 }
  0xe9   :  { %v3606_v23 = vadd.f32 %v2875_v20, %v135_v22 }
  0xea   :  { %v145_v42 = vmul.f32 0.35355338, %v3611_v24 }
  0xeb   :  { %848 = vrot.lane.b32.xlu1 %v3606_v23, %s3522_s19  ;;  %328 = vrot.lane.b32.xlu0 %v3606_v23, %s3523_s20  ;;  %v144_v31 = vmul.f32 0.35355338, %v3606_v23 }
  0xec   :  { %v204_v51 = vrot.slane %v145_v42, %v3619_v30  ;;  %v197_v58 = vcombine.high %v145_v42, %v145_v42 }
  0xed   :  { %v155_v32 = vrot.slane %v144_v31, %v3619_v30  ;;  %v148_v34 = vcombine.high %v144_v31, %v144_v31 }
  0xee   :  { %v212_v59 = vcombine.high %v204_v51, %v204_v51  ;;  %v220_v63 = vrot.slane %v204_v51, %v3619_v30  ;;  %v211_v2 = vrot.slane %v197_v58, %v3619_v30 }
  0xef   :  { %850 = vrot.lane.b32.xlu1 %v3611_v24, %s3522_s19  ;;  %330 = vrot.lane.b32.xlu0 %v3611_v24, %s3523_s20  ;;  %v163_v33 = vcombine.high %v155_v32, %v155_v32  ;;  %v171_v35 = vrot.slane %v155_v32, %v3619_v30  ;;  %v162_v38 = vrot.slane %v148_v34, %v3619_v30 }
  0xf0   :  { %v234_v5 = vrot.slane %v212_v59, %v3619_v30  ;;  %v281_v6 = vrot.slane %v220_v63, %v3626_v37  ;;  %v242_v7 = vcombine.high %v220_v63, %v220_v63  ;;  %v213_v12 = vcombine.high %v211_v2, %v211_v2 }
  0xf1   :  { %v185_v36 = vrot.slane %v163_v33, %v3619_v30  ;;  %v193_v39 = vcombine.high %v171_v35, %v171_v35  ;;  %v249_v40 = vrot.slane %v171_v35, %v3626_v37  ;;  %v164_v45 = vcombine.high %v162_v38, %v162_v38 }
  0xf2   :  { %v178_v49 = vrot.slane %v162_v38, %v3619_v30  ;;  %v285_v10 = vrot.slane %v234_v5, %v3626_v37  ;;  %v244_v11 = vcombine.high %v234_v5, %v234_v5  ;;  %v289_v13 = vrot.slane %v242_v7, %v3626_v37  ;;  %v24_v38 = vld [vmem:[%s4677_s3 + $0x8] sm:$0xff] }
  0xf3   :  { %v253_v41 = vrot.slane %v185_v36, %v3626_v37  ;;  %v195_v44 = vcombine.high %v185_v36, %v185_v36  ;;  %v257_v48 = vrot.slane %v193_v39, %v3626_v37  ;;  %v192_v53 = vrot.slane %v164_v45, %v3619_v30  ;;  %v23_v36 = vld [vmem:[%s4677_s3] sm:$0xff]  ;;  %v25_v39 = vld [vmem:[%s4677_s3 + $0x10] sm:$0xff] }
  0xf4   :  { %v265_v54 = vrot.slane %v178_v49, %v3626_v37  ;;  %v194_v55 = vcombine.high %v178_v49, %v178_v49  ;;  %v227_v14 = vrot.slane %v211_v2, %v3619_v30  ;;  %v293_v18 = vrot.slane %v244_v11, %v3626_v37 }
  0xf5   :  { %v261_v52 = vrot.slane %v195_v44, %v3626_v37  ;;  %v269_v60 = vrot.slane %v192_v53, %v3626_v37  ;;  %v196_v61 = vcombine.high %v192_v53, %v192_v53  ;;  %v241_v20 = vrot.slane %v213_v12, %v3619_v30 }
  0xf6   :  { %v273_v62 = vrot.slane %v194_v55, %v3626_v37  ;;  %v297_v21 = vrot.slane %v227_v14, %v3626_v37  ;;  %v243_v22 = vcombine.high %v227_v14, %v227_v14 }
  0xf7   :  { %v277_v4 = vrot.slane %v196_v61, %v3626_v37  ;;  %v301_v27 = vrot.slane %v241_v20, %v3626_v37  ;;  %v245_v28 = vcombine.high %v241_v20, %v241_v20 }
  0xf8   :  { %v305_v31 = vrot.slane %v243_v22, %v3626_v37 }
  0xf9   :  { %v309_v34 = vrot.slane %v245_v28, %v3626_v37 }
 0x15d   :  { %v329_v43 = vpop.permute.xlu0 %328 }
 0x15e   :  { %v334_v46 = vmul.f32 %v329_v43, %v249_v40  ;;  %v335_v47 = vmul.f32 %v329_v43, %v253_v41  ;;  %v336_v50 = vmul.f32 %v329_v43, %v257_v48  ;;  %v337_v56 = vmul.f32 %v329_v43, %v261_v52  ;;  %v26_v41 = vld [vmem:[%s4677_s3 + $0x18] sm:$0xff] }
 0x15f   :  { %v338_v57 = vmul.f32 %v329_v43, %v265_v54  ;;  %v339_v0 = vmul.f32 %v329_v43, %v269_v60  ;;  %v340_v1 = vmul.f32 %v329_v43, %v273_v62  ;;  %v341_v8 = vmul.f32 %v329_v43, %v277_v4 }
 0x160   :  { %3082 = vmatprep.mubr.msk.f32.mxu1 %vm350_vm1, %v334_v46  ;;  %v3271_v40 = vpack.c.bf16 %v24_v38, %v23_v36  ;;  %v3275_v42 = vpack.c.bf16 %v26_v41, %v25_v39 }
 0x161   :  { %3083 = vmatmul.mubr.msk.f32.vlgmr.msra.gmra.mrb[2].mxu1 %vm350_vm1, %v335_v47  ;;  %v331_v3 = vpop.permute.xlu0 %330 }
 0x162   :  { %3085 = vmatprep.mubr.msk.f32.mxu1 %vm350_vm1, %v336_v50  ;;  %v342_v9 = vmul.f32 %v331_v3, %v281_v6  ;;  %v343_v15 = vmul.f32 %v331_v3, %v285_v10  ;;  %v344_v16 = vmul.f32 %v331_v3, %v289_v13  ;;  %v345_v25 = vmul.f32 %v331_v3, %v293_v18 }
 0x163   :  { %v346_v26 = vmul.f32 %v331_v3, %v297_v21  ;;  %v347_v32 = vmul.f32 %v331_v3, %v301_v27  ;;  %v348_v33 = vmul.f32 %v331_v3, %v305_v31  ;;  %v349_v35 = vmul.f32 %v331_v3, %v309_v34  ;;  %3272 = vmatprep.subr.bf16.mxu0 %v3271_v40 }
 0x164   :  { %3274 = vmatpush3.bf16.msra.mxu0 %v3271_v40 }
 0x165   :  { %3086 = vmatmul.mubr.msk.f32.gmra.mrb[4].mxu1 %vm350_vm1, %v337_v56  ;;  %3276 = vmatprep.subr.bf16.mxu0 %v3275_v42 }
 0x166   :  { %3088 = vmatprep.mubr.msk.f32.mxu1 %vm350_vm1, %v338_v57 }
 0x168   :  { %3278 = vmatpush3.bf16.msra.mxu0 %v3275_v42 }
 0x169   :  { %3089 = vmatmul.mubr.msk.f32.gmra.mrb[6].mxu1 %vm350_vm1, %v339_v0 }
 0x16a   :  { %3091 = vmatprep.mubr.msk.f32.mxu1 %vm350_vm1, %v340_v1 }
 0x16d   :  { %3092 = vmatmul.mubr.msk.f32.gmra.mrb[8].mxu1 %vm350_vm1, %v341_v8 }
 0x16e   :  { %3094 = vmatprep.mubr.msk.f32.mxu1 %vm350_vm1, %v342_v9 }
 0x171   :  { %3095 = vmatmul.mubr.msk.f32.gmra.mrb[10].mxu1 %vm350_vm1, %v343_v15 }
 0x172   :  { %3097 = vmatprep.mubr.msk.f32.mxu1 %vm350_vm1, %v344_v16 }
 0x175   :  { %3098 = vmatmul.mubr.msk.f32.gmra.mrb[12].mxu1 %vm350_vm1, %v345_v25 }
 0x176   :  { %3100 = vmatprep.mubr.msk.f32.mxu1 %vm350_vm1, %v346_v26 }
 0x179   :  { %3101 = vmatmul.mubr.msk.f32.gmra.mrb[14].mxu1 %vm350_vm1, %v347_v32 }
 0x17a   :  { %3103 = vmatprep.mubr.msk.f32.mxu1 %vm350_vm1, %v348_v33 }
 0x17d   :  { %3104 = vmatmul.mubr.msk.f32.gmra.mrb[16].mxu1 %vm350_vm1, %v349_v35 }
 0x234   :  { %v3084_v43 = vpop.f32.mrb[2].mxu1 }
 0x235   :  { %v551_v44 = vsel %vm350_vm1, %v3084_v43, -inf  ;;  %v465_v45 = vpop.f32.mrb[3].mxu1 }
 0x236   :  { %v552_v46 = vrot.slane %v551_v44, 4  ;;  %v544_v47 = vsel %vm350_vm1, %v465_v45, -inf }
 0x237   :  { %v545_v48 = vrot.slane %v544_v47, 4 }
 0x238   :  { %v553_v49 = vmax.f32 %v551_v44, %v552_v46  ;;  %v3087_v50 = vpop.f32.mrb[4].mxu1 }
 0x239   :  { %v546_v51 = vmax.f32 %v544_v47, %v545_v48  ;;  %v565_v52 = vsel %vm350_vm1, %v3087_v50, -inf  ;;  %v475_v53 = vpop.f32.mrb[5].mxu1 }
 0x23a   :  { %v554_v54 = vrot.slane %v553_v49, 2  ;;  %v566_v55 = vrot.slane %v565_v52, 4  ;;  %v558_v56 = vsel %vm350_vm1, %v475_v53, -inf }
 0x23b   :  { %v547_v57 = vrot.slane %v546_v51, 2  ;;  %v559_v58 = vrot.slane %v558_v56, 4 }
 0x23c   :  { %v555_v59 = vmax.f32 %v553_v49, %v554_v54  ;;  %v567_v60 = vmax.f32 %v565_v52, %v566_v55  ;;  %v3686_v61 = vpop.f32.mrb[6].mxu1 }
 0x23d   :  { %v548_v62 = vmax.f32 %v546_v51, %v547_v57  ;;  %v560_v63 = vmax.f32 %v558_v56, %v559_v58  ;;  %v579_v0 = vsel %vm350_vm1, %v3686_v61, -inf  ;;  %v3690_v1 = vpop.f32.mrb[7].mxu1 }
 0x23e   :  { %v556_v2 = vrot.slane %v555_v59, 1  ;;  %v568_v3 = vrot.slane %v567_v60, 2  ;;  %v580_v4 = vrot.slane %v579_v0, 4  ;;  %v572_v5 = vsel %vm350_vm1, %v3690_v1, -inf }
 0x23f   :  { %v549_v6 = vrot.slane %v548_v62, 1  ;;  %v561_v7 = vrot.slane %v560_v63, 2  ;;  %v573_v8 = vrot.slane %v572_v5, 4 }
 0x240   :  { %v557_v9 = vmax.f32 %v555_v59, %v556_v2  ;;  %v569_v10 = vmax.f32 %v567_v60, %v568_v3  ;;  %v581_v11 = vmax.f32 %v579_v0, %v580_v4  ;;  %v3694_v12 = vpop.f32.mrb[8].mxu1 }
 0x241   :  { %v550_v13 = vmax.f32 %v548_v62, %v549_v6  ;;  %v562_v14 = vmax.f32 %v560_v63, %v561_v7  ;;  %v574_v15 = vmax.f32 %v572_v5, %v573_v8  ;;  %v593_v16 = vsel %vm350_vm1, %v3694_v12, -inf  ;;  %v3698_v18 = vpop.f32.mrb[9].mxu1 }
 0x242   :  { %v657_v20 = vsub.f32 %v3084_v43, %v557_v9  ;;  %v570_v21 = vrot.slane %v569_v10, 1  ;;  %v582_v22 = vrot.slane %v581_v11, 2  ;;  %v594_v25 = vrot.slane %v593_v16, 4 }
 0x243   :  { %v656_v26 = vsub.f32 %v465_v45, %v550_v13  ;;  %v563_v27 = vrot.slane %v562_v14, 1  ;;  %v575_v28 = vrot.slane %v574_v15, 2  ;;  %v586_v31 = vsel %vm350_vm1, %v3698_v18, -inf }
 0x244   :  { %v674_v32 = vmul.f32 1.442695, %v657_v20  ;;  %v571_v33 = vmax.f32 %v569_v10, %v570_v21  ;;  %v583_v34 = vmax.f32 %v581_v11, %v582_v22  ;;  %v595_v35 = vmax.f32 %v593_v16, %v594_v25  ;;  %v3702_v36 = vpop.f32.mrb[10].mxu1 }
 0x245   :  { %v672_v38 = vmul.f32 1.442695, %v656_v26  ;;  %v564_v39 = vmax.f32 %v562_v14, %v563_v27  ;;  %v576_v40 = vmax.f32 %v574_v15, %v575_v28  ;;  %v587_v41 = vrot.slane %v586_v31, 4  ;;  %v3704_v42 = vpop.f32.mrb[11].mxu1 }
 0x246   :  { %3347 = vpow2.f32 %v674_v32  ;;  %v659_v43 = vsub.f32 %v3087_v50, %v571_v33  ;;  %v584_v44 = vrot.slane %v583_v34, 1  ;;  %v596_v45 = vrot.slane %v595_v35, 2 }
 0x247   :  { %3349 = vpow2.f32 %v672_v38  ;;  %v658_v46 = vsub.f32 %v475_v53, %v564_v39  ;;  %v577_v47 = vrot.slane %v576_v40, 1  ;;  %v588_v48 = vmax.f32 %v586_v31, %v587_v41 }
 0x248   :  { %v678_v49 = vmul.f32 1.442695, %v659_v43  ;;  %v585_v51 = vmax.f32 %v583_v34, %v584_v44  ;;  %v597_v52 = vmax.f32 %v595_v35, %v596_v45  ;;  %v607_v54 = vsel %vm350_vm1, %v3702_v36, -inf  ;;  %v3708_v55 = vpop.f32.mrb[12].mxu1 }
 0x249   :  { %v676_v56 = vmul.f32 1.442695, %v658_v46  ;;  %v578_v57 = vmax.f32 %v576_v40, %v577_v47  ;;  %v589_v58 = vrot.slane %v588_v48, 2  ;;  %v608_v59 = vrot.slane %v607_v54, 4  ;;  %v3710_v60 = vpop.f32.mrb[13].mxu1 }
 0x24a   :  { %3351 = vpow2.f32 %v678_v49  ;;  %v661_v50 = vsub.f32 %v3686_v61, %v585_v51  ;;  %v598_v53 = vrot.slane %v597_v52, 1  ;;  %v600_v62 = vsel %vm350_vm1, %v3704_v42, -inf }
 0x24b   :  { %3353 = vpow2.f32 %v676_v56  ;;  %v660_v63 = vsub.f32 %v3690_v1, %v578_v57  ;;  %v590_v0 = vmax.f32 %v588_v48, %v589_v58  ;;  %v609_v2 = vmax.f32 %v607_v54, %v608_v59 }
 0x24c   :  { %v682_v3 = vmul.f32 1.442695, %v661_v50  ;;  %v599_v4 = vmax.f32 %v597_v52, %v598_v53  ;;  %v601_v5 = vrot.slane %v600_v62, 4  ;;  %v621_v6 = vsel %vm350_vm1, %v3708_v55, -inf  ;;  %v3718_v7 = vpop.f32.mrb[14].mxu1 }
 0x24d   :  { %v680_v8 = vmul.f32 1.442695, %v660_v63  ;;  %v591_v9 = vrot.slane %v590_v0, 1  ;;  %v610_v61 = vrot.slane %v609_v2, 2  ;;  %v622_v10 = vrot.slane %v621_v6, 4  ;;  %v3720_v11 = vpop.f32.mrb[15].mxu1 }
 0x24e   :  { %3355 = vpow2.f32 %v682_v3  ;;  %v663_v13 = vsub.f32 %v3694_v12, %v599_v4  ;;  %v602_v1 = vmax.f32 %v600_v62, %v601_v5  ;;  %v614_v14 = vsel %vm350_vm1, %v3710_v60, -inf }
 0x24f   :  { %3357 = vpow2.f32 %v680_v8  ;;  %v592_v15 = vmax.f32 %v590_v0, %v591_v9  ;;  %v611_v16 = vmax.f32 %v609_v2, %v610_v61  ;;  %v623_v20 = vmax.f32 %v621_v6, %v622_v10 }
 0x250   :  { %v3725_v21 = vpop.eup %3347  ;;  %v686_v22 = vmul.f32 1.442695, %v663_v13  ;;  %v603_v25 = vrot.slane %v602_v1, 2  ;;  %v615_v26 = vrot.slane %v614_v14, 4  ;;  %v3729_v27 = vsel %vm350_vm1, %v3718_v7, -inf  ;;  %v3731_v28 = vpop.f32.mrb[16].mxu1 }
 0x251   :  { %v3733_v12 = vpop.eup %3349  ;;  %v711_v31 = vsel %vm350_vm1, %v3725_v21, 0.0  ;;  %v662_v32 = vsub.f32 %v3698_v18, %v592_v15  ;;  %v612_v33 = vrot.slane %v611_v16, 1  ;;  %v624_v34 = vrot.slane %v623_v20, 2  ;;  %v3738_v35 = vpop.f32.mrb[17].mxu1 }
 0x252   :  { %v712_v38 = vrot.slane %v711_v31, 4  ;;  %v704_v39 = vsel %vm350_vm1, %v3733_v12, 0.0  ;;  %3359 = vpow2.f32 %v686_v22  ;;  %v604_v40 = vmax.f32 %v602_v1, %v603_v25 }
 0x253   :  { %v705_v41 = vrot.slane %v704_v39, 4  ;;  %v684_v43 = vmul.f32 1.442695, %v662_v32  ;;  %v613_v44 = vmax.f32 %v611_v16, %v612_v33  ;;  %v625_v45 = vmax.f32 %v623_v20, %v624_v34 }
 0x254   :  { %v3742_v46 = vpop.eup %3351  ;;  %v713_v47 = vadd.f32 %v712_v38, %v711_v31  ;;  %v605_v48 = vrot.slane %v604_v40, 1  ;;  %v3744_v49 = vmax.f32 %v614_v14, %v615_v26  ;;  %v636_v18 = vrot.slane %v3729_v27, 4 }
 0x255   :  { %v3747_v51 = vpop.eup %3353  ;;  %v706_v52 = vadd.f32 %v705_v41, %v704_v39  ;;  %v725_v54 = vsel %vm350_vm1, %v3742_v46, 0.0  ;;  %3361 = vpow2.f32 %v684_v43  ;;  %v665_v56 = vsub.f32 %v3702_v36, %v613_v44 }
 0x256   :  { %v714_v57 = vrot.slane %v713_v47, 2  ;;  %v726_v58 = vrot.slane %v725_v54, 4  ;;  %v718_v59 = vsel %vm350_vm1, %v3747_v51, 0.0  ;;  %v606_v50 = vmax.f32 %v604_v40, %v605_v48 }
 0x257   :  { %v707_v53 = vrot.slane %v706_v52, 2  ;;  %v719_v62 = vrot.slane %v718_v59, 4  ;;  %v690_v63 = vmul.f32 1.442695, %v665_v56  ;;  %v626_v0 = vrot.slane %v625_v45, 1 }
 0x258   :  { %v3754_v2 = vpop.eup %3355  ;;  %v715_v3 = vadd.f32 %v714_v57, %v713_v47  ;;  %v727_v4 = vadd.f32 %v726_v58, %v725_v54  ;;  %v664_v5 = vsub.f32 %v3704_v42, %v606_v50  ;;  %v617_v6 = vrot.slane %v3744_v49, 2 }
 0x259   :  { %v3758_v8 = vpop.eup %3357  ;;  %v708_v36 = vadd.f32 %v707_v53, %v706_v52  ;;  %v720_v9 = vadd.f32 %v719_v62, %v718_v59  ;;  %v739_v61 = vsel %vm350_vm1, %v3754_v2, 0.0  ;;  %3363 = vpow2.f32 %v690_v63 }
 0x25a   :  { %v716_v10 = vrot.slane %v715_v3, 1  ;;  %v728_v13 = vrot.slane %v727_v4, 2  ;;  %v740_v1 = vrot.slane %v739_v61, 4  ;;  %v732_v14 = vsel %vm350_vm1, %v3758_v8, 0.0 }
 0x25b   :  { %v709_v15 = vrot.slane %v708_v36, 1  ;;  %v721_v16 = vrot.slane %v720_v9, 2  ;;  %v733_v20 = vrot.slane %v732_v14, 4  ;;  %v688_v42 = vmul.f32 1.442695, %v664_v5 }
 0x25c   :  { %v3764_v22 = vpop.eup %3359  ;;  %v717_v25 = vadd.f32 %v716_v10, %v715_v3  ;;  %v729_v26 = vadd.f32 %v728_v13, %v727_v4  ;;  %v741_v31 = vadd.f32 %v740_v1, %v739_v61  ;;  %v627_v32 = vmax.f32 %v625_v45, %v626_v0 }
 0x25d   :  { %v710_v33 = vadd.f32 %v709_v15, %v708_v36  ;;  %v722_v34 = vadd.f32 %v721_v16, %v720_v9  ;;  %v734_v38 = vadd.f32 %v733_v20, %v732_v14  ;;  %v753_v39 = vsel %vm350_vm1, %v3764_v22, 0.0 }
 0x25e   :  { %3365 = vrcp.f32 %v717_v25  ;;  %v730_v40 = vrot.slane %v729_v26, 1  ;;  %v742_v41 = vrot.slane %v741_v31, 2  ;;  %v754_v43 = vrot.slane %v753_v39, 4 }
 0x25f   :  { %v3768_v44 = vpop.eup %3361  ;;  %3367 = vrcp.f32 %v710_v33  ;;  %v723_v47 = vrot.slane %v722_v34, 1  ;;  %v735_v48 = vrot.slane %v734_v38, 2  ;;  %v667_v52 = vsub.f32 %v3708_v55, %v627_v32 }
 0x260   :  { %v731_v54 = vadd.f32 %v730_v40, %v729_v26  ;;  %v743_v56 = vadd.f32 %v742_v41, %v741_v31  ;;  %v755_v45 = vadd.f32 %v754_v43, %v753_v39  ;;  %v746_v57 = vsel %vm350_vm1, %v3768_v44, 0.0  ;;  %v3785_v40 = vpop.permute.xlu1 %848 }
 0x261   :  { %v724_v58 = vadd.f32 %v723_v47, %v722_v34  ;;  %v736_v59 = vadd.f32 %v735_v48, %v734_v38  ;;  %v747_v50 = vrot.slane %v746_v57, 4  ;;  %3369 = vpow2.f32 %v688_v42 }
 0x262   :  { %3371 = vrcp.f32 %v731_v54  ;;  %v744_v53 = vrot.slane %v743_v56, 1  ;;  %v756_v62 = vrot.slane %v755_v45, 2  ;;  %v694_v63 = vmul.f32 1.442695, %v667_v52 }
 0x263   :  { %v3773_v0 = vpop.eup %3363  ;;  %3373 = vrcp.f32 %v724_v58  ;;  %v737_v3 = vrot.slane %v736_v59, 1  ;;  %v748_v4 = vadd.f32 %v747_v50, %v746_v57  ;;  %v618_v55 = vmax.f32 %v3744_v49, %v617_v6 }
 0x264   :  { %v745_v5 = vadd.f32 %v744_v53, %v743_v56  ;;  %v757_v36 = vadd.f32 %v756_v62, %v755_v45  ;;  %v767_v9 = vsel %vm350_vm1, %v3773_v0, 0.0  ;;  %3375 = vpow2.f32 %v694_v63 }
 0x265   :  { %v738_v61 = vadd.f32 %v737_v3, %v736_v59  ;;  %v749_v10 = vrot.slane %v748_v4, 2  ;;  %v768_v13 = vrot.slane %v767_v9, 4  ;;  %v619_v1 = vrot.slane %v618_v55, 1 }
 0x266   :  { %3377 = vrcp.f32 %v745_v5  ;;  %v758_v14 = vrot.slane %v757_v36, 1  ;;  %v637_v15 = vmax.f32 %v3729_v27, %v636_v18  ;;  %v628_v16 = vsel %vm350_vm1, %v3720_v11, -inf }
 0x267   :  { %3379 = vrcp.f32 %v738_v61  ;;  %v750_v49 = vadd.f32 %v749_v10, %v748_v4  ;;  %v769_v6 = vadd.f32 %v768_v13, %v767_v9  ;;  %v620_v20 = vmax.f32 %v618_v55, %v619_v1 }
 0x268   :  { %v3366_v42 = vpop.eup %3365  ;;  %v759_v25 = vadd.f32 %v758_v14, %v757_v36  ;;  %v638_v26 = vrot.slane %v637_v15, 2  ;;  %v629_v31 = vrot.slane %v628_v16, 4 }
 0x269   :  { %v3368_v32 = vpop.eup %3367  ;;  %v819_v33 = vmul.f32 %v3366_v42, %v3725_v21  ;;  %v751_v34 = vrot.slane %v750_v49, 1  ;;  %v770_v38 = vrot.slane %v769_v6, 2  ;;  %v666_v39 = vsub.f32 %v3710_v60, %v620_v20 }
 0x26a   :  { %v817_v27 = vmul.f32 %v3368_v32, %v3733_v12  ;;  %3381 = vrcp.f32 %v759_v25  ;;  %v639_v18 = vmax.f32 %v637_v15, %v638_v26  ;;  %v630_v41 = vmax.f32 %v628_v16, %v629_v31 }
 0x26b   :  { %v3788_v43 = vpop.eup %3369  ;;  %v855_v47 = vmul.f32 %v3785_v40, %v819_v33  ;;  %v752_v48 = vadd.f32 %v751_v34, %v750_v49  ;;  %v771_v52 = vadd.f32 %v770_v38, %v769_v6  ;;  %v692_v54 = vmul.f32 1.442695, %v666_v39 }
 0x26c   :  { %v3372_v56 = vpop.eup %3371  ;;  %v854_v21 = vmul.f32 %v3785_v40, %v817_v27  ;;  %v760_v60 = vsel %vm350_vm1, %v3788_v43, 0.0  ;;  %v640_v45 = vrot.slane %v639_v18, 1  ;;  %v631_v57 = vrot.slane %v630_v41, 2 }
 0x26d   :  { %v3374_v58 = vpop.eup %3373  ;;  %v877_v12 = vsel %vm350_vm1, %v855_v47, 0.0  ;;  %v823_v59 = vmul.f32 %v3372_v56, %v3742_v46  ;;  %3383 = vrcp.f32 %v752_v48  ;;  %v772_v50 = vrot.slane %v771_v52, 1 }
 0x26e   :  { %v3796_v53 = vpop.eup %3375  ;;  %v878_v62 = vrot.slane %v877_v12, 4  ;;  %v870_v63 = vsel %vm350_vm1, %v854_v21, 0.0  ;;  %v821_v3 = vmul.f32 %v3374_v58, %v3747_v51  ;;  %v761_v4 = vrot.slane %v760_v60, 4 }
 0x26f   :  { %v871_v55 = vrot.slane %v870_v63, 4  ;;  %v857_v5 = vmul.f32 %v3785_v40, %v823_v59  ;;  %v773_v36 = vadd.f32 %v772_v50, %v771_v52  ;;  %v781_v9 = vsel %vm350_vm1, %v3796_v53, 0.0 }
 0x270   :  { %v3378_v61 = vpop.eup %3377  ;;  %v879_v10 = vadd.f32 %v878_v62, %v877_v12  ;;  %v856_v46 = vmul.f32 %v3785_v40, %v821_v3  ;;  %v762_v13 = vadd.f32 %v761_v4, %v760_v60  ;;  %v782_v1 = vrot.slane %v781_v9, 4 }
 0x271   :  { %v3380_v14 = vpop.eup %3379  ;;  %v872_v15 = vadd.f32 %v871_v55, %v870_v63  ;;  %v3805_v16 = vsel %vm350_vm1, %v857_v5, 0.0  ;;  %v827_v51 = vmul.f32 %v3378_v61, %v3754_v2  ;;  %3385 = vrcp.f32 %v773_v36 }
 0x272   :  { %v880_v49 = vrot.slane %v879_v10, 2  ;;  %v884_v6 = vsel %vm350_vm1, %v856_v46, 0.0  ;;  %v825_v20 = vmul.f32 %v3380_v14, %v3758_v8  ;;  %v649_v42 = vsel %vm350_vm1, %v3731_v28, -inf }
 0x273   :  { %v873_v25 = vrot.slane %v872_v15, 2  ;;  %v892_v26 = vrot.slane %v3805_v16, 4  ;;  %v885_v31 = vrot.slane %v884_v6, 4  ;;  %v763_v32 = vrot.slane %v762_v13, 2 }
 0x274   :  { %v3382_v33 = vpop.eup %3381  ;;  %v3814_v34 = vmul.f32 %v3785_v40, %v827_v51  ;;  %v783_v38 = vadd.f32 %v782_v1, %v781_v9  ;;  %3387 = vpow2.f32 %v692_v54  ;;  %v641_v2 = vmax.f32 %v639_v18, %v640_v45  ;;  %v3827_v1 = vpop.permute.xlu1 %850 }
 0x275   :  { %v858_v39 = vmul.f32 %v3785_v40, %v825_v20  ;;  %v831_v27 = vmul.f32 %v3382_v33, %v3764_v22  ;;  %v764_v8 = vadd.f32 %v763_v32, %v762_v13  ;;  %v632_v47 = vmax.f32 %v630_v41, %v631_v57 }
 0x276   :  { %v784_v48 = vrot.slane %v783_v38, 2  ;;  %v669_v52 = vsub.f32 %v3718_v7, %v641_v2  ;;  %v650_v56 = vrot.slane %v649_v42, 4  ;;  %v642_v21 = vsel %vm350_vm1, %v3738_v35, -inf }
 0x277   :  { %v3384_v60 = vpop.eup %3383  ;;  %v886_v58 = vadd.f32 %v885_v31, %v884_v6  ;;  %v765_v12 = vrot.slane %v764_v8, 1  ;;  %v633_v59 = vrot.slane %v632_v47, 1  ;;  %v643_v50 = vrot.slane %v642_v21, 4 }
 0x278   :  { %v829_v18 = vmul.f32 %v3384_v60, %v3768_v44  ;;  %v785_v54 = vadd.f32 %v784_v48, %v783_v38  ;;  %v698_v45 = vmul.f32 1.442695, %v669_v52  ;;  %v651_v62 = vmax.f32 %v649_v42, %v650_v56 }
 0x279   :  { %v766_v22 = vadd.f32 %v765_v12, %v764_v8  ;;  %v634_v63 = vmax.f32 %v632_v47, %v633_v59  ;;  %v644_v41 = vmax.f32 %v642_v21, %v643_v50  ;;  %v874_v57 = vadd.f32 %v873_v25, %v872_v15 }
 0x27a   :  { %v786_v3 = vrot.slane %v785_v54, 1  ;;  %3389 = vpow2.f32 %v698_v45  ;;  %v652_v7 = vrot.slane %v651_v62, 2  ;;  %v3823_v4 = vmul.f32 %v3785_v40, %v831_v27 }
 0x27b   :  { %v3386_v55 = vpop.eup %3385  ;;  %3391 = vrcp.f32 %v766_v22  ;;  %v668_v5 = vsub.f32 %v3720_v11, %v634_v63  ;;  %v645_v36 = vrot.slane %v644_v41, 2  ;;  %v875_v9 = vrot.slane %v874_v57, 1 }
 0x27c   :  { %v835_v44 = vmul.f32 %v3386_v55, %v3773_v0  ;;  %v787_v61 = vadd.f32 %v786_v3, %v785_v54  ;;  %v653_v46 = vmax.f32 %v651_v62, %v652_v7  ;;  %v881_v13 = vadd.f32 %v880_v49, %v879_v10 }
 0x27d   :  { %v696_v14 = vmul.f32 1.442695, %v668_v5  ;;  %v646_v15 = vmax.f32 %v644_v41, %v645_v36  ;;  %v3830_v51 = vmul.f32 %v3785_v40, %v829_v18  ;;  %v887_v6 = vrot.slane %v886_v58, 2 }
 0x27e   :  { %v3832_v20 = vpop.eup %3387  ;;  %v863_v42 = vmul.f32 %v3827_v1, %v835_v44  ;;  %3393 = vrcp.f32 %v787_v61  ;;  %v654_v11 = vrot.slane %v653_v46, 1  ;;  %v882_v25 = vrot.slane %v881_v13, 1 }
 0x27f   :  { %v774_v0 = vsel %vm350_vm1, %v3832_v20, 0.0  ;;  %3395 = vpow2.f32 %v696_v14  ;;  %v647_v10 = vrot.slane %v646_v15, 1  ;;  %v888_v49 = vadd.f32 %v887_v6, %v886_v58 }
 0x280   :  { %v933_v31 = vsel %vm350_vm1, %v863_v42, 0.0  ;;  %v775_v32 = vrot.slane %v774_v0, 4  ;;  %v655_v33 = vmax.f32 %v653_v46, %v654_v11  ;;  %v3838_v40 = vadd.f32 %v875_v9, %v874_v57 }
 0x281   :  { %v934_v38 = vrot.slane %v933_v31, 4  ;;  %v648_v2 = vmax.f32 %v646_v15, %v647_v10  ;;  %v3840_v27 = vadd.f32 %v882_v25, %v881_v13  ;;  %v893_v8 = vadd.f32 %v892_v26, %v3805_v16 }
 0x282   :  { %v776_v47 = vadd.f32 %v775_v32, %v774_v0  ;;  %v671_v48 = vsub.f32 %v3731_v28, %v655_v33  ;;  %v898_v52 = vsel %vm350_vm1, %v858_v39, 0.0  ;;  %v905_v56 = vsel %vm350_vm1, %v3814_v34, 0.0 }
 0x283   :  { %v935_v21 = vadd.f32 %v934_v38, %v933_v31  ;;  %v670_v60 = vsub.f32 %v3738_v35, %v648_v2  ;;  %v889_v58 = vrot.slane %v888_v49, 1  ;;  %v894_v12 = vrot.slane %v893_v8, 2 }
 0x284   :  { %v3850_v59 = vpop.eup %3389  ;;  %v777_v50 = vrot.slane %v776_v47, 2  ;;  %v702_v18 = vmul.f32 1.442695, %v671_v48  ;;  %v899_v54 = vrot.slane %v898_v52, 4  ;;  %v906_v45 = vrot.slane %v905_v56, 4 }
 0x285   :  { %v3392_v16 = vpop.eup %3391  ;;  %v936_v26 = vrot.slane %v935_v21, 2  ;;  %v795_v28 = vsel %vm350_vm1, %v3850_v59, 0.0  ;;  %v700_v39 = vmul.f32 1.442695, %v670_v60  ;;  %v895_v62 = vadd.f32 %v894_v12, %v893_v8 }
 0x286   :  { %v833_v34 = vmul.f32 %v3392_v16, %v3788_v43  ;;  %v778_v22 = vadd.f32 %v777_v50, %v776_v47  ;;  %v796_v63 = vrot.slane %v795_v28, 4  ;;  %3397 = vpow2.f32 %v702_v18 }
 0x287   :  { %v3855_v35 = vadd.f32 %v936_v26, %v935_v21  ;;  %3399 = vpow2.f32 %v700_v39  ;;  %v3857_v41 = vadd.f32 %v889_v58, %v888_v49  ;;  %v900_v57 = vadd.f32 %v899_v54, %v898_v52 }
 0x288   :  { %v3394_v3 = vpop.eup %3393  ;;  %v862_v7 = vmul.f32 %v3827_v1, %v833_v34  ;;  %v779_v55 = vrot.slane %v778_v22, 1  ;;  %v797_v5 = vadd.f32 %v796_v63, %v795_v28  ;;  %v907_v36 = vadd.f32 %v906_v45, %v905_v56 }
 0x289   :  { %v3860_v9 = vpop.eup %3395  ;;  %v938_v44 = vrot.slane %v3855_v35, 1  ;;  %v839_v43 = vmul.f32 %v3394_v3, %v3796_v53  ;;  %v896_v61 = vrot.slane %v895_v62, 1  ;;  %v901_v46 = vrot.slane %v900_v57, 2 }
 0x28a   :  { %v926_v13 = vsel %vm350_vm1, %v862_v7, 0.0  ;;  %v780_v14 = vadd.f32 %v779_v55, %v778_v22  ;;  %v798_v15 = vrot.slane %v797_v5, 2  ;;  %v788_v6 = vsel %vm350_vm1, %v3860_v9, 0.0 }
 0x28b   :  { %v927_v42 = vrot.slane %v926_v13, 4  ;;  %v865_v11 = vmul.f32 %v3827_v1, %v839_v43  ;;  %v789_v25 = vrot.slane %v788_v6, 4  ;;  %v902_v0 = vadd.f32 %v901_v46, %v900_v57 }
 0x28c   :  { %3401 = vrcp.f32 %v780_v14  ;;  %v799_v10 = vadd.f32 %v798_v15, %v797_v5  ;;  %v908_v53 = vrot.slane %v907_v36, 2  ;;  %v912_v49 = vsel %vm350_vm1, %v3830_v51, 0.0 }
 0x28d   :  { %v928_v31 = vadd.f32 %v927_v42, %v926_v13  ;;  %v947_v32 = vsel %vm350_vm1, %v865_v11, 0.0  ;;  %v790_v33 = vadd.f32 %v789_v25, %v788_v6  ;;  %v903_v38 = vrot.slane %v902_v0, 1 }
 0x28e   :  { %v948_v2 = vrot.slane %v947_v32, 4  ;;  %v800_v8 = vrot.slane %v799_v10, 1  ;;  %v909_v47 = vadd.f32 %v908_v53, %v907_v36  ;;  %v913_v48 = vrot.slane %v912_v49, 4 }
 0x28f   :  { %v929_v52 = vrot.slane %v928_v31, 2  ;;  %v791_v56 = vrot.slane %v790_v33, 2  ;;  %v897_v21 = vadd.f32 %v896_v61, %v895_v62  ;;  %v919_v60 = vsel %vm350_vm1, %v3823_v4, 0.0 }
 0x290   :  { %v3873_v58 = vpop.eup %3397  ;;  %v801_v51 = vadd.f32 %v800_v8, %v799_v10  ;;  %v904_v12 = vadd.f32 %v903_v38, %v902_v0  ;;  %v910_v50 = vrot.slane %v909_v47, 1  ;;  %v914_v18 = vadd.f32 %v913_v48, %v912_v49 }
 0x291   :  { %v3875_v54 = vpop.eup %3399  ;;  %v930_v45 = vadd.f32 %v929_v52, %v928_v31  ;;  %v792_v16 = vadd.f32 %v791_v56, %v790_v33  ;;  %v809_v26 = vsel %vm350_vm1, %v3873_v58, 0.0  ;;  %v920_v28 = vrot.slane %v919_v60, 4 }
 0x292   :  { %v949_v39 = vadd.f32 %v948_v2, %v947_v32  ;;  %3403 = vrcp.f32 %v801_v51  ;;  %v810_v62 = vrot.slane %v809_v26, 4  ;;  %v802_v4 = vsel %vm350_vm1, %v3875_v54, 0.0 }
 0x293   :  { %v931_v34 = vrot.slane %v930_v45, 1  ;;  %v793_v22 = vrot.slane %v792_v16, 1  ;;  %v803_v63 = vrot.slane %v802_v4, 4  ;;  %v911_v57 = vadd.f32 %v910_v50, %v909_v47 }
 0x294   :  { %v811_v3 = vadd.f32 %v810_v62, %v809_v26  ;;  %v915_v7 = vrot.slane %v914_v18, 2  ;;  %v921_v55 = vadd.f32 %v920_v28, %v919_v60  ;;  %v1003_v5 = vsel %vm1002_vm2, %v3840_v27, %v3838_v40 }
 0x295   :  { %v794_v36 = vadd.f32 %v793_v22, %v792_v16  ;;  %v804_v43 = vadd.f32 %v803_v63, %v802_v4  ;;  %v1005_v61 = vsel %vm1004_vm3, %v3857_v41, %v1003_v5  ;;  %v932_v46 = vadd.f32 %v931_v34, %v930_v45 }
 0x296   :  { %v3402_v13 = vpop.eup %3401  ;;  %v812_v14 = vrot.slane %v811_v3, 2  ;;  %v916_v15 = vadd.f32 %v915_v7, %v914_v18  ;;  %v922_v6 = vrot.slane %v921_v55, 2  ;;  %v1007_v42 = vsel %vm1006_vm4, %v897_v21, %v1005_v61 }
 0x297   :  { %v837_v11 = vmul.f32 %v3402_v13, %v3832_v20  ;;  %3405 = vrcp.f32 %v794_v36  ;;  %v805_v25 = vrot.slane %v804_v43, 2  ;;  %v1009_v0 = vsel %vm1008_vm5, %v904_v12, %v1007_v42 }
 0x298   :  { %v813_v10 = vadd.f32 %v812_v14, %v811_v3  ;;  %v917_v40 = vrot.slane %v916_v15, 1  ;;  %v923_v27 = vadd.f32 %v922_v6, %v921_v55  ;;  %v1011_v53 = vsel %vm1010_vm6, %v911_v57, %v1009_v0 }
 0x299   :  { %v864_v41 = vmul.f32 %v3827_v1, %v837_v11  ;;  %v806_v49 = vadd.f32 %v805_v25, %v804_v43  ;;  %v939_v31 = vadd.f32 %v938_v44, %v3855_v35  ;;  %v950_v38 = vrot.slane %v949_v39, 2 }
 0x29a   :  { %v814_v32 = vrot.slane %v813_v10, 1  ;;  %v918_v33 = vadd.f32 %v917_v40, %v916_v15  ;;  %v924_v20 = vrot.slane %v923_v27, 1 }
 0x29b   :  { %v940_v2 = vsel %vm350_vm1, %v864_v41, 0.0  ;;  %v807_v8 = vrot.slane %v806_v49, 1  ;;  %v1016_v47 = vsel %vm1002_vm2, %v939_v31, %v932_v46  ;;  %v951_v18 = vadd.f32 %v950_v38, %v949_v39 }
 0x29c   :  { %v3404_v48 = vpop.eup %3403  ;;  %v941_v52 = vrot.slane %v940_v2, 4  ;;  %v815_v56 = vadd.f32 %v814_v32, %v813_v10  ;;  %v925_v21 = vadd.f32 %v924_v20, %v923_v27  ;;  %v1013_v60 = vsel %vm1012_vm7, %v918_v33, %v1011_v53 }
 0x29d   :  { %v843_v51 = vmul.f32 %v3404_v48, %v3850_v59  ;;  %v808_v12 = vadd.f32 %v807_v8, %v806_v49  ;;  %v952_v59 = vrot.slane %v951_v18, 1 }
 0x29e   :  { %v942_v35 = vadd.f32 %v941_v52, %v940_v2  ;;  %3407 = vrcp.f32 %v815_v56  ;;  %v1015_v44 = vsel %vm1014_vm8, %v925_v21, %v1013_v60  ;;  %v3921_v21 = vld [vmem:[%s4677_s3 + $0xc0] sm:$0xff] }
 0x29f   :  { %v867_v50 = vmul.f32 %v3827_v1, %v843_v51  ;;  %3409 = vrcp.f32 %v808_v12  ;;  %3114 = vmatprep.mubr.msk.f32.mxu0 %vm350_vm1, %v1015_v44  ;;  %v953_v5 = vadd.f32 %v952_v59, %v951_v18  ;;  %v985_v60 = vrot.slane %v3921_v21, %v3626_v37 }
 0x2a0   :  { %v943_v45 = vrot.slane %v942_v35, 2 }
 0x2a1   :  { %v3406_v16 = vpop.eup %3405  ;;  %v961_v26 = vsel %vm350_vm1, %v867_v50, 0.0  ;;  %v3519_v50 = vld [vmem:[%s4676_s0 + $0x8] sm:$0xff] }
 0x2a2   :  { %v944_v28 = vadd.f32 %v943_v45, %v942_v35  ;;  %v841_v62 = vmul.f32 %v3406_v16, %v3860_v9  ;;  %v962_v4 = vrot.slane %v961_v26, 4  ;;  %v3520_v45 = vld [vmem:[%s4676_s0] sm:$0xff] }
 0x2a4   :  { %v866_v34 = vmul.f32 %v3827_v1, %v841_v62  ;;  %v945_v22 = vrot.slane %v944_v28, 1  ;;  %v963_v63 = vadd.f32 %v962_v4, %v961_v26  ;;  %v27_v62 = vld [vmem:[%s4677_s3 + $0x20] sm:$0xff]  ;;  %v28_v4 = vld [vmem:[%s4677_s3 + $0x28] sm:$0xff] }
 0x2a5   :  { %v3295_v59 = vpack.c.bf16 %v28_v4, %v27_v62 }
 0x2a6   :  { %v954_v57 = vsel %vm350_vm1, %v866_v34, 0.0  ;;  %v946_v3 = vadd.f32 %v945_v22, %v944_v28  ;;  %v964_v7 = vrot.slane %v963_v63, 2 }
 0x2a7   :  { %v955_v55 = vrot.slane %v954_v57, 4  ;;  %3296 = vmatprep.subr.bf16.mxu1 %v3295_v59 }
 0x2a8   :  { %v3408_v39 = vpop.eup %3407  ;;  %v1017_v36 = vsel %vm1004_vm3, %v946_v3, %v1016_v47  ;;  %v965_v14 = vadd.f32 %v964_v7, %v963_v63  ;;  %3298 = vmatpush3.bf16.msra.mxu1 %v3295_v59 }
 0x2a9   :  { %v3410_v43 = vpop.eup %3409  ;;  %v847_v61 = vmul.f32 %v3408_v39, %v3873_v58  ;;  %v956_v46 = vadd.f32 %v955_v55, %v954_v57  ;;  %v1018_v9 = vsel %vm1006_vm4, %v953_v5, %v1017_v36  ;;  %v1143_v36 = vld [vmem:[%s4678_s2] sm:$0xff] }
 0x2aa   :  { %v845_v13 = vmul.f32 %v3410_v43, %v3875_v54  ;;  %v966_v0 = vrot.slane %v965_v14, 1  ;;  %v1144_v43 = vld [vmem:[%s4678_s2 + $0x8] sm:$0xff] }
 0x2ab   :  { %v869_v15 = vmul.f32 %v3827_v1, %v847_v61  ;;  %v957_v6 = vrot.slane %v956_v46, 2  ;;  %v3279_v61 = vpack.c.bf16 %v1144_v43, %v1143_v36 }
 0x2ac   :  { %v868_v42 = vmul.f32 %v3827_v1, %v845_v13  ;;  %v967_v31 = vadd.f32 %v966_v0, %v965_v14  ;;  %v1147_v14 = vld [vmem:[%s4678_s2 + $0x20] sm:$0xff]  ;;  %v1150_v0 = vld [vmem:[%s4678_s2 + $0x38] sm:$0xff] }
 0x2ad   :  { %v958_v11 = vadd.f32 %v957_v6, %v956_v46  ;;  %v975_v25 = vsel %vm350_vm1, %v869_v15, 0.0  ;;  %3280 = vmatprep.subr.bf16.mxu0 %v3279_v61  ;;  %v1145_v46 = vld [vmem:[%s4678_s2 + $0x10] sm:$0xff]  ;;  %v30_v6 = vld [vmem:[%s4677_s3 + $0x38] sm:$0xff] }
 0x2ae   :  { %v968_v10 = vsel %vm350_vm1, %v868_v42, 0.0  ;;  %v976_v40 = vrot.slane %v975_v25, 4  ;;  %v29_v15 = vld [vmem:[%s4677_s3 + $0x30] sm:$0xff] }
 0x2af   :  { %v959_v27 = vrot.slane %v958_v11, 1  ;;  %v969_v58 = vrot.slane %v968_v10, 4 }
 0x2b0   :  { %v977_v53 = vadd.f32 %v976_v40, %v975_v25  ;;  %v1149_v25 = vld [vmem:[%s4678_s2 + $0x30] sm:$0xff] }
 0x2b1   :  { %v960_v41 = vadd.f32 %v959_v27, %v958_v11  ;;  %v970_v49 = vadd.f32 %v969_v58, %v968_v10  ;;  %v3299_v11 = vpack.c.bf16 %v30_v6, %v29_v15  ;;  %v3291_v10 = vpack.c.bf16 %v1150_v0, %v1149_v25  ;;  %v19_v40 = vld [vmem:[%s4676_s0 + $0x10] sm:$0xff]  ;;  %v20_v27 = vld [vmem:[%s4676_s0 + $0x18] sm:$0xff]  ;;  %v21_v58 = vld [vmem:[%s4676_s0 + $0x20] sm:$0xff] }
 0x2b2   :  { %v978_v54 = vrot.slane %v977_v53, 2 }
 0x2b3   :  { %v971_v32 = vrot.slane %v970_v49, 2  ;;  %v1019_v33 = vsel %vm1008_vm5, %v960_v41, %v1018_v9  ;;  %v1146_v9 = vld [vmem:[%s4678_s2 + $0x18] sm:$0xff]  ;;  %3300 = vmatprep.subr.bf16.mxu1 %v3299_v11 }
 0x2b4   :  { %v979_v20 = vadd.f32 %v978_v54, %v977_v53  ;;  %v1020_v1 = vsel %vm1010_vm6, %v967_v31, %v1019_v33  ;;  %v3283_v13 = vpack.c.bf16 %v1146_v9, %v1145_v46  ;;  %3302 = vmatpush3.bf16.msra.mxu1 %v3299_v11  ;;  %v22_v53 = vld [vmem:[%s4676_s0 + $0x28] sm:$0xff] }
 0x2b5   :  { %v972_v38 = vadd.f32 %v971_v32, %v970_v49 }
 0x2b6   :  { %v980_v2 = vrot.slane %v979_v20, 1 }
 0x2b7   :  { %v973_v8 = vrot.slane %v972_v38, 1 }
 0x2b8   :  { %v981_v48 = vadd.f32 %v980_v2, %v979_v20  ;;  %v1133_v20 = vsub.s32 3, %v3616_v29 }
 0x2b9   :  { %v974_v47 = vadd.f32 %v973_v8, %v972_v38 }
 0x2bb   :  { %v1021_v52 = vsel %vm1012_vm7, %v974_v47, %v1020_v1  ;;  %v1139_v1 = vsub.s32 4, %v3616_v29 }
 0x2bc   :  { %v1022_v56 = vsel %vm1014_vm8, %v981_v48, %v1021_v52 }
 0x2bd   :  { %3115 = vmatmul.mubr.msk.f32.vlgmr.msra.gmra.mrb[0].mxu0 %vm350_vm1, %v1022_v56  ;;  %v1140_v8 = vrot.slane %v3921_v21, %v1139_v1 }
 0x2be   :  { %3282 = vmatpush3.bf16.msra.mxu0 %v3279_v61  ;;  %3133 = vmatprep.mubr.msk.f32.mxu0 %vm62_vm0, %v19_v40 }
 0x2bf   :  { %3284 = vmatprep.subr.bf16.mxu0 %v3283_v13 }
 0x2c2   :  { %3286 = vmatpush3.bf16.msra.mxu0 %v3283_v13 }
 0x390   :  { %v3116_v51 = vpop.f32.mrb[0].mxu0 }
 0x391   :  { %v1099_v12 = vadd.f32 %v3116_v51, %v985_v60  ;;  %v1093_v35 = vpop.f32.mrb[1].mxu0 }
 0x392   :  { %v1094_v44 = vadd.f32 %v1093_v35, %v985_v60 }
 0x393   :  { %v1103_v18 = vadd.f32 %v3519_v50, %v1099_v12 }
 0x394   :  { %v1102_v16 = vadd.f32 %v3520_v45, %v1094_v44 }
 0x395   :  { %v1107_v26 = vsel %vm350_vm1, %v1103_v18, 0.0 }
 0x396   :  { %1108 = vadd.xlane.f32.xlu1 %v1107_v26  ;;  %v1104_v28 = vsel %vm350_vm1, %v1102_v16, 0.0 }
 0x397   :  { %1105 = vadd.xlane.f32.xlu0 %v1104_v28 }
 0x3a7   :  { %1253 = vrot.lane.b32.xlu1 %v3606_v23, %s3525_s8 }
 0x423   :  { %v1109_v34 = vpop.xlane.xlu1 %1108 }
 0x424   :  { %v1112_v22 = vmul.f32 0.03125, %v1109_v34  ;;  %v1106_v63 = vpop.xlane.xlu0 %1105 }
 0x425   :  { %v1111_v57 = vmul.f32 0.03125, %v1106_v63 }
 0x426   :  { %v3940_v3 = vsub.f32 %v1103_v18, %v1112_v22 }
 0x427   :  { %v1113_v7 = vsub.f32 %v1102_v16, %v1111_v57  ;;  %v1254_v28 = vpop.permute.xlu1 %1253 }
 0x428   :  { %v1116_v5 = vmul.f32 %v3940_v3, %v3940_v3 }
 0x429   :  { %v1115_v55 = vmul.f32 %v1113_v7, %v1113_v7 }
 0x42a   :  { %v1120_v39 = vsel %vm350_vm1, %v1116_v5, 0.0 }
 0x42b   :  { %v1117_v23 = vsel %vm350_vm1, %v1115_v55, 0.0 }
 0x42c   :  { %1118 = vadd.xlane.f32.xlu0 %v1117_v23 }
 0x430   :  { %1121 = vadd.xlane.f32.xlu0 %v1120_v39 }
 0x446   :  { %1255 = vrot.lane.b32.xlu0 %v3611_v24, %s3525_s8  ;;  %v1148_v24 = vld [vmem:[%s4678_s2 + $0x28] sm:$0xff] }
 0x447   :  { %v3287_v42 = vpack.c.bf16 %v1148_v24, %v1147_v14 }
 0x449   :  { %3288 = vmatprep.subr.bf16.mxu0 %v3287_v42 }
 0x44a   :  { %3290 = vmatpush3.bf16.msra.mxu0 %v3287_v42 }
 0x44b   :  { %3292 = vmatprep.subr.bf16.mxu0 %v3291_v10 }
 0x44e   :  { %3294 = vmatpush3.bf16.msra.mxu0 %v3291_v10 }
 0x44f   :  { %3304 = vmatprep.subr.bf16.mxu0 %v3592_v17 }
 0x451   :  { %3134 = vmatmul.mubr.msk.f32.vlgmr.msra.gmra.mrb[2].mxu0 %vm62_vm0, %v20_v27 }
 0x452   :  { %3136 = vmatprep.mubr.msk.f32.mxu0 %vm62_vm0, %v21_v58  ;;  %3306 = vmatpush3.bf16.msra.mxu0 %v3592_v17  ;;  %v1134_v17 = vrot.slane %v3921_v21, %v1133_v20  ;;  %v2896_v21 = vld [vmem:[%s4678_s2 + $0x40] ss:$0 sm:$0xff] }
 0x453   :  { %3308 = vmatprep.subr.bf16.mxu0 %v3597_v19 }
 0x455   :  { %3137 = vmatmul.mubr.msk.f32.gmra.mrb[4].mxu0 %vm62_vm0, %v22_v53 }
 0x456   :  { %3310 = vmatpush3.bf16.msra.mxu0 %v3597_v19 }
 0x4b9   :  { %v1119_v41 = vpop.xlane.xlu0 %1118 }
 0x4ba   :  { %v1123_v49 = vmul.f32 0.03125, %v1119_v41 }
 0x4bc   :  { %v1125_v31 = vadd.f32 1e-05, %v1123_v49 }
 0x4bd   :  { %v1122_v54 = vpop.xlane.xlu0 %1121 }
 0x4be   :  { %3411 = vrsqrt.f32 %v1125_v31  ;;  %v1124_v32 = vmul.f32 0.03125, %v1122_v54 }
 0x4c0   :  { %v1126_v33 = vadd.f32 1e-05, %v1124_v32 }
 0x4c1   :  { %v1256_v6 = vpop.permute.xlu0 %1255 }
 0x4c2   :  { %3413 = vrsqrt.f32 %v1126_v33 }
 0x4c8   :  { %v3412_v38 = vpop.eup %3411 }
 0x4c9   :  { %v1129_v2 = vmul.f32 %v3412_v38, %v1113_v7 }
 0x4cb   :  { %v1135_v47 = vmul.f32 %v1134_v17, %v1129_v2 }
 0x4cc   :  { %v3414_v19 = vpop.eup %3413 }
 0x4cd   :  { %v1130_v48 = vmul.f32 %v3414_v19, %v3940_v3  ;;  %v4002_v52 = vadd.f32 %v1140_v8, %v1135_v47 }
 0x4cf   :  { %v1136_v56 = vmul.f32 %v1134_v17, %v1130_v48  ;;  %3147 = vmatprep.mubr.msk.f32.mxu1 %vm350_vm1, %v4002_v52 }
 0x4d1   :  { %v4006_v60 = vadd.f32 %v1140_v8, %v1136_v56 }
 0x4d3   :  { %3148 = vmatmul.mubr.msk.f32.vlgmr.msra.gmra.mrb[18].mxu1 %vm350_vm1, %v4006_v60 }
 0x524   :  { %v3135_v51 = vpop.f32.mrb[2].mxu0 }
 0x525   :  { %v1234_v12 = vpop.f32.mrb[3].mxu0  ;;  %v4017_v18 = vadd.f32 %v3135_v51, %v2896_v21 }
 0x526   :  { %v4013_v35 = vadd.f32 %v2896_v21, %v1234_v12 }
 0x528   :  { %v3138_v44 = vpop.f32.mrb[4].mxu0  ;;  %2311 = vrot.lane.b32.xlu1 %v4013_v35, %s3523_s20 }
 0x529   :  { %v1244_v50 = vpop.f32.mrb[5].mxu0  ;;  %v4025_v16 = vadd.f32 %v3138_v44, %v2896_v21 }
 0x52a   :  { %v4019_v45 = vadd.f32 %v2896_v21, %v1244_v50 }
 0x52c   :  { %2313 = vrot.lane.b32.xlu1 %v4017_v18, %s3523_s20  ;;  %2315 = vrot.lane.b32.xlu0 %v4019_v45, %s3523_s20 }
 0x530   :  { %2317 = vrot.lane.b32.xlu1 %v4025_v16, %s3523_s20 }
 0x5a6   :  { %v3149_v26 = vpop.f32.mrb[18].mxu1 }
 0x5a7   :  { %v1331_v62 = vpop.f32.mrb[19].mxu1  ;;  %v1337_v11 = vadd.f32 %v3149_v26, %v1256_v6 }
 0x5a8   :  { %v1332_v4 = vadd.f32 %v1331_v62, %v1254_v28 }
 0x5a9   :  { %v1341_v27 = vmul.f32 0.35355338, %v1337_v11 }
 0x5aa   :  { %v1340_v59 = vmul.f32 0.35355338, %v1332_v4 }
 0x5ab   :  { %v1400_v31 = vrot.slane %v1341_v27, %v3619_v30  ;;  %v1393_v51 = vcombine.high %v1341_v27, %v1341_v27 }
 0x5ac   :  { %v1351_v34 = vrot.slane %v1340_v59, %v3619_v30  ;;  %v1344_v3 = vcombine.high %v1340_v59, %v1340_v59 }
 0x5ad   :  { %v1408_v1 = vcombine.high %v1400_v31, %v1400_v31  ;;  %v1416_v17 = vrot.slane %v1400_v31, %v3619_v30 }
 0x5ae   :  { %v1359_v22 = vcombine.high %v1351_v34, %v1351_v34  ;;  %v1367_v63 = vrot.slane %v1351_v34, %v3619_v30  ;;  %v1358_v43 = vrot.slane %v1344_v3, %v3619_v30 }
 0x5af   :  { %v1430_v47 = vrot.slane %v1408_v1, %v3619_v30  ;;  %v1477_v19 = vrot.slane %v1416_v17, %v3626_v37  ;;  %v1438_v21 = vcombine.high %v1416_v17, %v1416_v17 }
 0x5b0   :  { %v1381_v57 = vrot.slane %v1359_v22, %v3619_v30  ;;  %v1389_v7 = vcombine.high %v1367_v63, %v1367_v63  ;;  %v1445_v55 = vrot.slane %v1367_v63, %v3626_v37  ;;  %v1360_v13 = vcombine.high %v1358_v43, %v1358_v43 }
 0x5b1   :  { %v1374_v14 = vrot.slane %v1358_v43, %v3619_v30  ;;  %v1481_v12 = vrot.slane %v1430_v47, %v3626_v37  ;;  %v1538_v44 = vmul.f32 %v1477_v19, %v4019_v45  ;;  %v1539_v50 = vmul.f32 %v1477_v19, %v4025_v16 }
 0x5b2   :  { %v1449_v23 = vrot.slane %v1381_v57, %v3626_v37  ;;  %v1522_v5 = vmul.f32 %v1445_v55, %v4013_v35  ;;  %v1523_v39 = vmul.f32 %v1445_v55, %v4017_v18  ;;  %v1391_v61 = vcombine.high %v1381_v57, %v1381_v57 }
 0x5b3   :  { %v1453_v46 = vrot.slane %v1389_v7, %v3626_v37  ;;  %v1388_v25 = vrot.slane %v1360_v13, %v3619_v30  ;;  %v1461_v0 = vrot.slane %v1374_v14, %v3626_v37  ;;  %v1390_v58 = vcombine.high %v1374_v14, %v1374_v14 }
 0x5b4   :  { %v1524_v36 = vmul.f32 %v1449_v23, %v4013_v35  ;;  %3158 = vmatprep.mubr.msk.f32.mxu0 %vm350_vm1, %v1522_v5  ;;  %v1525_v9 = vmul.f32 %v1449_v23, %v4017_v18  ;;  %v1457_v15 = vrot.slane %v1391_v61, %v3626_v37  ;;  %v1440_v26 = vcombine.high %v1430_v47, %v1430_v47 }
 0x5b5   :  { %3159 = vmatmul.mubr.msk.f32.vlgmr.msra.gmra.mrb[6].mxu0 %vm350_vm1, %v1523_v39  ;;  %v1526_v24 = vmul.f32 %v1453_v46, %v4013_v35  ;;  %v1527_v42 = vmul.f32 %v1453_v46, %v4017_v18  ;;  %v1530_v53 = vmul.f32 %v1461_v0, %v4013_v35  ;;  %v1465_v41 = vrot.slane %v1388_v25, %v3626_v37 }
 0x5b6   :  { %3161 = vmatprep.mubr.msk.f32.mxu0 %vm350_vm1, %v1524_v36  ;;  %v1528_v10 = vmul.f32 %v1457_v15, %v4013_v35  ;;  %v1529_v40 = vmul.f32 %v1457_v15, %v4017_v18  ;;  %v1531_v49 = vmul.f32 %v1461_v0, %v4017_v18  ;;  %v1392_v54 = vcombine.high %v1388_v25, %v1388_v25 }
 0x5b7   :  { %v1532_v32 = vmul.f32 %v1465_v41, %v4013_v35  ;;  %v1469_v33 = vrot.slane %v1390_v58, %v3626_v37  ;;  %v1533_v20 = vmul.f32 %v1465_v41, %v4017_v18  ;;  %v1485_v28 = vrot.slane %v1438_v21, %v3626_v37 }
 0x5b8   :  { %v1473_v2 = vrot.slane %v1392_v54, %v3626_v37  ;;  %v1540_v62 = vmul.f32 %v1481_v12, %v4019_v45  ;;  %v1489_v22 = vrot.slane %v1440_v26, %v3626_v37 }
 0x5b9   :  { %3162 = vmatmul.mubr.msk.f32.gmra.mrb[8].mxu0 %vm350_vm1, %v1525_v9  ;;  %v1534_v38 = vmul.f32 %v1469_v33, %v4013_v35  ;;  %v1535_v8 = vmul.f32 %v1469_v33, %v4017_v18  ;;  %v1542_v34 = vmul.f32 %v1485_v28, %v4019_v45  ;;  %v1543_v63 = vmul.f32 %v1485_v28, %v4025_v16 }
 0x5ba   :  { %3164 = vmatprep.mubr.msk.f32.mxu0 %vm350_vm1, %v1526_v24  ;;  %v1536_v48 = vmul.f32 %v1473_v2, %v4013_v35  ;;  %v1537_v56 = vmul.f32 %v1473_v2, %v4017_v18  ;;  %v1407_v35 = vrot.slane %v1393_v51, %v3619_v30  ;;  %v1541_v18 = vmul.f32 %v1481_v12, %v4025_v16 }
 0x5bb   :  { %v1544_v7 = vmul.f32 %v1489_v22, %v4019_v45  ;;  %v1545_v55 = vmul.f32 %v1489_v22, %v4025_v16 }
 0x5bc   :  { %v1409_v4 = vcombine.high %v1407_v35, %v1407_v35  ;;  %v1423_v59 = vrot.slane %v1407_v35, %v3619_v30 }
 0x5bd   :  { %3165 = vmatmul.mubr.msk.f32.gmra.mrb[10].mxu0 %vm350_vm1, %v1527_v42 }
 0x5be   :  { %3167 = vmatprep.mubr.msk.f32.mxu0 %vm350_vm1, %v1528_v10  ;;  %v1437_v57 = vrot.slane %v1409_v4, %v3619_v30  ;;  %v1493_v3 = vrot.slane %v1423_v59, %v3626_v37  ;;  %v1439_v23 = vcombine.high %v1423_v59, %v1423_v59 }
 0x5c0   :  { %v1546_v5 = vmul.f32 %v1493_v3, %v4019_v45  ;;  %v1497_v39 = vrot.slane %v1437_v57, %v3626_v37  ;;  %v1547_v30 = vmul.f32 %v1493_v3, %v4025_v16  ;;  %v1441_v36 = vcombine.high %v1437_v57, %v1437_v57 }
 0x5c1   :  { %3168 = vmatmul.mubr.msk.f32.gmra.mrb[12].mxu0 %vm350_vm1, %v1529_v40  ;;  %v1501_v61 = vrot.slane %v1439_v23, %v3626_v37 }
 0x5c2   :  { %3170 = vmatprep.mubr.msk.f32.mxu0 %vm350_vm1, %v1530_v53  ;;  %v1548_v43 = vmul.f32 %v1497_v39, %v4019_v45  ;;  %v1549_v46 = vmul.f32 %v1497_v39, %v4025_v16  ;;  %v1505_v13 = vrot.slane %v1441_v36, %v3626_v37 }
 0x5c3   :  { %v1550_v9 = vmul.f32 %v1501_v61, %v4019_v45  ;;  %v1551_v14 = vmul.f32 %v1501_v61, %v4025_v16 }
 0x5c4   :  { %v1552_v24 = vmul.f32 %v1505_v13, %v4019_v45  ;;  %v1553_v15 = vmul.f32 %v1505_v13, %v4025_v16 }
 0x5c5   :  { %3171 = vmatmul.mubr.msk.f32.gmra.mrb[14].mxu0 %vm350_vm1, %v1531_v49 }
 0x5c6   :  { %3173 = vmatprep.mubr.msk.f32.mxu0 %vm350_vm1, %v1532_v32 }
 0x5c9   :  { %3174 = vmatmul.mubr.msk.f32.gmra.mrb[16].mxu0 %vm350_vm1, %v1533_v20 }
 0x5ca   :  { %3176 = vmatprep.mubr.msk.f32.mxu0 %vm350_vm1, %v1534_v38 }
 0x5cd   :  { %3177 = vmatmul.mubr.msk.f32.gmra.mrb[18].mxu0 %vm350_vm1, %v1535_v8 }
 0x5ce   :  { %3179 = vmatprep.mubr.msk.f32.mxu0 %vm350_vm1, %v1536_v48 }
 0x5d1   :  { %3180 = vmatmul.mubr.msk.f32.gmra.mrb[20].mxu0 %vm350_vm1, %v1537_v56 }
 0x5d2   :  { %3182 = vmatprep.mubr.msk.f32.mxu0 %vm350_vm1, %v1538_v44 }
 0x5d5   :  { %3183 = vmatmul.mubr.msk.f32.gmra.mrb[22].mxu0 %vm350_vm1, %v1539_v50 }
 0x5d6   :  { %3185 = vmatprep.mubr.msk.f32.mxu0 %vm350_vm1, %v1540_v62 }
 0x5d9   :  { %3186 = vmatmul.mubr.msk.f32.gmra.mrb[24].mxu0 %vm350_vm1, %v1541_v18 }
 0x5da   :  { %3188 = vmatprep.mubr.msk.f32.mxu0 %vm350_vm1, %v1542_v34 }
 0x5dd   :  { %3189 = vmatmul.mubr.msk.f32.gmra.mrb[26].mxu0 %vm350_vm1, %v1543_v63 }
 0x5de   :  { %3191 = vmatprep.mubr.msk.f32.mxu0 %vm350_vm1, %v1544_v7 }
 0x5e1   :  { %3192 = vmatmul.mubr.msk.f32.gmra.mrb[28].mxu0 %vm350_vm1, %v1545_v55 }
 0x5e2   :  { %3194 = vmatprep.mubr.msk.f32.mxu0 %vm350_vm1, %v1546_v5 }
 0x5e5   :  { %3195 = vmatmul.mubr.msk.f32.gmra.mrb[30].mxu0 %vm350_vm1, %v1547_v30 }
 0x5e6   :  { %3197 = vmatprep.mubr.msk.f32.mxu0 %vm350_vm1, %v1548_v43 }
 0x5e9   :  { %3198 = vmatmul.mubr.msk.f32.gmra.mrb[32].mxu0 %vm350_vm1, %v1549_v46 }
 0x5ea   :  { %3200 = vmatprep.mubr.msk.f32.mxu0 %vm350_vm1, %v1550_v9 }
 0x5ed   :  { %3201 = vmatmul.mubr.msk.f32.gmra.mrb[34].mxu0 %vm350_vm1, %v1551_v14 }
 0x5ee   :  { %3203 = vmatprep.mubr.msk.f32.mxu0 %vm350_vm1, %v1552_v24 }
 0x5f1   :  { %3204 = vmatmul.mubr.msk.f32.gmra.mrb[36].mxu0 %vm350_vm1, %v1553_v15 }
 0x688   :  { %v3160_v6 = vpop.f32.mrb[6].mxu0 }
 0x689   :  { %v1876_v42 = vsel %vm350_vm1, %v3160_v6, -inf  ;;  %v1716_v37 = vpop.f32.mrb[7].mxu0 }
 0x68a   :  { %v1875_v11 = vsel %vm350_vm1, %v1716_v37, -inf }
 0x68b   :  { %v1877_v25 = vmax.f32 %v1875_v11, %v1876_v42 }
 0x68c   :  { %v3163_v0 = vpop.f32.mrb[8].mxu0 }
 0x68d   :  { %v1878_v10 = vrot.slane %v1877_v25, 4  ;;  %v1885_v40 = vsel %vm350_vm1, %v3163_v0, -inf  ;;  %v1726_v45 = vpop.f32.mrb[9].mxu0 }
 0x68e   :  { %v1884_v27 = vsel %vm350_vm1, %v1726_v45, -inf }
 0x68f   :  { %v1879_v58 = vmax.f32 %v1877_v25, %v1878_v10  ;;  %v1886_v53 = vmax.f32 %v1884_v27, %v1885_v40 }
 0x690   :  { %v4125_v41 = vpop.f32.mrb[10].mxu0 }
 0x691   :  { %v1880_v16 = vrot.slane %v1879_v58, 2  ;;  %v1887_v49 = vrot.slane %v1886_v53, 4  ;;  %v1894_v31 = vsel %vm350_vm1, %v4125_v41, -inf  ;;  %v1736_v54 = vpop.f32.mrb[11].mxu0 }
 0x692   :  { %v1893_v32 = vsel %vm350_vm1, %v1736_v54, -inf }
 0x693   :  { %v1881_v33 = vmax.f32 %v1879_v58, %v1880_v16  ;;  %v1888_v20 = vmax.f32 %v1886_v53, %v1887_v49  ;;  %v1895_v1 = vmax.f32 %v1893_v32, %v1894_v31 }
 0x694   :  { %v4130_v17 = vpop.f32.mrb[12].mxu0 }
 0x695   :  { %v1882_v38 = vrot.slane %v1881_v33, 1  ;;  %v1889_v2 = vrot.slane %v1888_v20, 2  ;;  %v1896_v8 = vrot.slane %v1895_v1, 4  ;;  %v1903_v47 = vsel %vm350_vm1, %v4130_v17, -inf  ;;  %v4134_v19 = vpop.f32.mrb[13].mxu0 }
 0x696   :  { %v1902_v48 = vsel %vm350_vm1, %v4134_v19, -inf }
 0x697   :  { %v1883_v56 = vmax.f32 %v1881_v33, %v1882_v38  ;;  %v1890_v51 = vmax.f32 %v1888_v20, %v1889_v2  ;;  %v1897_v21 = vmax.f32 %v1895_v1, %v1896_v8  ;;  %v1904_v12 = vmax.f32 %v1902_v48, %v1903_v47 }
 0x698   :  { %v4138_v44 = vpop.f32.mrb[14].mxu0 }
 0x699   :  { %v2019_v50 = vsub.f32 %v1716_v37, %v1883_v56  ;;  %v2020_v35 = vsub.f32 %v3160_v6, %v1883_v56  ;;  %v1891_v26 = vrot.slane %v1890_v51, 1  ;;  %v1898_v28 = vrot.slane %v1897_v21, 2  ;;  %v4140_v62 = vpop.f32.mrb[15].mxu0 }
 0x69a   :  { %v1905_v18 = vrot.slane %v1904_v12, 4  ;;  %v1912_v4 = vsel %vm350_vm1, %v4138_v44, -inf  ;;  %v1911_v59 = vsel %vm350_vm1, %v4140_v62, -inf }
 0x69b   :  { %v2051_v34 = vmul.f32 1.442695, %v2019_v50  ;;  %v2053_v22 = vmul.f32 1.442695, %v2020_v35  ;;  %v1892_v63 = vmax.f32 %v1890_v51, %v1891_v26  ;;  %v1899_v57 = vmax.f32 %v1897_v21, %v1898_v28 }
 0x69c   :  { %v1906_v3 = vmax.f32 %v1904_v12, %v1905_v18  ;;  %v1913_v7 = vmax.f32 %v1911_v59, %v1912_v4  ;;  %v4146_v55 = vpop.f32.mrb[16].mxu0 }
 0x69d   :  { %3415 = vpow2.f32 %v2051_v34  ;;  %v2021_v23 = vsub.f32 %v1726_v45, %v1892_v63  ;;  %v2022_v5 = vsub.f32 %v3163_v0, %v1892_v63  ;;  %v1900_v39 = vrot.slane %v1899_v57, 1  ;;  %v4148_v30 = vpop.f32.mrb[17].mxu0 }
 0x69e   :  { %3417 = vpow2.f32 %v2053_v22  ;;  %v1907_v36 = vrot.slane %v1906_v3, 2  ;;  %v1914_v43 = vrot.slane %v1913_v7, 4  ;;  %v1921_v61 = vsel %vm350_vm1, %v4146_v55, -inf }
 0x69f   :  { %v2055_v46 = vmul.f32 1.442695, %v2021_v23  ;;  %v2057_v9 = vmul.f32 1.442695, %v2022_v5  ;;  %v1901_v13 = vmax.f32 %v1899_v57, %v1900_v39  ;;  %v1920_v14 = vsel %vm350_vm1, %v4148_v30, -inf }
 0x6a0   :  { %v1908_v24 = vmax.f32 %v1906_v3, %v1907_v36  ;;  %v1915_v15 = vmax.f32 %v1913_v7, %v1914_v43  ;;  %v1922_v6 = vmax.f32 %v1920_v14, %v1921_v61  ;;  %v4154_v42 = vpop.f32.mrb[18].mxu0 }
 0x6a1   :  { %3419 = vpow2.f32 %v2055_v46  ;;  %v2023_v37 = vsub.f32 %v1736_v54, %v1901_v13  ;;  %v2024_v11 = vsub.f32 %v4125_v41, %v1901_v13  ;;  %v1930_v25 = vsel %vm350_vm1, %v4154_v42, -inf  ;;  %v4159_v0 = vpop.f32.mrb[19].mxu0 }
 0x6a2   :  { %3421 = vpow2.f32 %v2057_v9  ;;  %v1909_v10 = vrot.slane %v1908_v24, 1  ;;  %v1916_v40 = vrot.slane %v1915_v15, 2  ;;  %v1923_v45 = vrot.slane %v1922_v6, 4 }
 0x6a3   :  { %v2059_v27 = vmul.f32 1.442695, %v2023_v37  ;;  %v2061_v58 = vmul.f32 1.442695, %v2024_v11  ;;  %v1929_v53 = vsel %vm350_vm1, %v4159_v0, -inf }
 0x6a4   :  { %v1910_v16 = vmax.f32 %v1908_v24, %v1909_v10  ;;  %v1917_v49 = vmax.f32 %v1915_v15, %v1916_v40  ;;  %v1924_v31 = vmax.f32 %v1922_v6, %v1923_v45  ;;  %v1931_v54 = vmax.f32 %v1929_v53, %v1930_v25  ;;  %v4163_v32 = vpop.f32.mrb[20].mxu0 }
 0x6a5   :  { %3423 = vpow2.f32 %v2059_v27  ;;  %v1939_v41 = vsel %vm350_vm1, %v4163_v32, -inf  ;;  %v4167_v33 = vpop.f32.mrb[21].mxu0 }
 0x6a6   :  { %3425 = vpow2.f32 %v2061_v58  ;;  %v2025_v20 = vsub.f32 %v4134_v19, %v1910_v16  ;;  %v2026_v1 = vsub.f32 %v4130_v17, %v1910_v16  ;;  %v1918_v38 = vrot.slane %v1917_v49, 1 }
 0x6a7   :  { %v4171_v2 = vpop.eup %3415  ;;  %v1925_v8 = vrot.slane %v1924_v31, 2  ;;  %v1932_v47 = vrot.slane %v1931_v54, 4  ;;  %v1938_v48 = vsel %vm350_vm1, %v4167_v33, -inf }
 0x6a8   :  { %v4175_v56 = vpop.eup %3417  ;;  %v2115_v51 = vsel %vm350_vm1, %v4171_v2, 0.0  ;;  %v2063_v21 = vmul.f32 1.442695, %v2025_v20  ;;  %v2065_v12 = vmul.f32 1.442695, %v2026_v1  ;;  %v1919_v50 = vmax.f32 %v1917_v49, %v1918_v38  ;;  %v4179_v35 = vpop.f32.mrb[22].mxu0 }
 0x6a9   :  { %v2116_v17 = vsel %vm350_vm1, %v4175_v56, 0.0  ;;  %v1926_v19 = vmax.f32 %v1924_v31, %v1925_v8  ;;  %v1933_v26 = vmax.f32 %v1931_v54, %v1932_v47  ;;  %v1940_v28 = vmax.f32 %v1938_v48, %v1939_v41  ;;  %v4183_v18 = vpop.f32.mrb[23].mxu0 }
 0x6aa   :  { %v2117_v4 = vadd.f32 %v2116_v17, %v2115_v51  ;;  %3427 = vpow2.f32 %v2063_v21  ;;  %v2027_v59 = vsub.f32 %v4140_v62, %v1919_v50  ;;  %v2028_v34 = vsub.f32 %v4138_v44, %v1919_v50 }
 0x6ab   :  { %v4187_v22 = vpop.eup %3419  ;;  %3429 = vpow2.f32 %v2065_v12  ;;  %v1927_v63 = vrot.slane %v1926_v19, 1  ;;  %v1934_v57 = vrot.slane %v1933_v26, 2  ;;  %v1941_v3 = vrot.slane %v1940_v28, 4 }
 0x6ac   :  { %v4189_v7 = vpop.eup %3421  ;;  %v2118_v23 = vrot.slane %v2117_v4, 4  ;;  %v2124_v5 = vsel %vm350_vm1, %v4187_v22, 0.0  ;;  %v2067_v39 = vmul.f32 1.442695, %v2027_v59  ;;  %v2069_v36 = vmul.f32 1.442695, %v2028_v34 }
 0x6ad   :  { %v2125_v43 = vsel %vm350_vm1, %v4189_v7, 0.0  ;;  %v1928_v62 = vmax.f32 %v1926_v19, %v1927_v63  ;;  %v1935_v61 = vmax.f32 %v1933_v26, %v1934_v57  ;;  %v1942_v44 = vmax.f32 %v1940_v28, %v1941_v3  ;;  %v4195_v46 = vpop.f32.mrb[24].mxu0 }
 0x6ae   :  { %v2119_v9 = vadd.f32 %v2118_v23, %v2117_v4  ;;  %v2126_v13 = vadd.f32 %v2125_v43, %v2124_v5  ;;  %3431 = vpow2.f32 %v2067_v39  ;;  %v1948_v14 = vsel %vm350_vm1, %v4179_v35, -inf  ;;  %v4199_v24 = vpop.f32.mrb[25].mxu0 }
 0x6af   :  { %v4201_v15 = vpop.eup %3423  ;;  %3433 = vpow2.f32 %v2069_v36  ;;  %v2029_v6 = vsub.f32 %v4148_v30, %v1928_v62  ;;  %v2030_v37 = vsub.f32 %v4146_v55, %v1928_v62  ;;  %v1936_v11 = vrot.slane %v1935_v61, 1 }
 0x6b0   :  { %v4205_v25 = vpop.eup %3425  ;;  %v2120_v10 = vrot.slane %v2119_v9, 2  ;;  %v2127_v40 = vrot.slane %v2126_v13, 4  ;;  %v2133_v45 = vsel %vm350_vm1, %v4201_v15, 0.0  ;;  %v1943_v27 = vrot.slane %v1942_v44, 2  ;;  %v4209_v58 = vpop.f32.mrb[26].mxu0 }
 0x6b1   :  { %v2134_v53 = vsel %vm350_vm1, %v4205_v25, 0.0  ;;  %v2071_v16 = vmul.f32 1.442695, %v2029_v6  ;;  %v2073_v49 = vmul.f32 1.442695, %v2030_v37  ;;  %v1937_v31 = vmax.f32 %v1935_v61, %v1936_v11  ;;  %v4213_v30 = vpop.f32.mrb[27].mxu0 }
 0x6b2   :  { %v2121_v55 = vadd.f32 %v2120_v10, %v2119_v9  ;;  %v2128_v54 = vadd.f32 %v2127_v40, %v2126_v13  ;;  %v2135_v41 = vadd.f32 %v2134_v53, %v2133_v45  ;;  %v1944_v20 = vmax.f32 %v1942_v44, %v1943_v27 }
 0x6b3   :  { %3435 = vpow2.f32 %v2071_v16  ;;  %v2031_v1 = vsub.f32 %v4159_v0, %v1937_v31  ;;  %v2032_v38 = vsub.f32 %v4154_v42, %v1937_v31  ;;  %v1947_v8 = vsel %vm350_vm1, %v4183_v18, -inf }
 0x6b4   :  { %v4219_v47 = vpop.eup %3427  ;;  %v2122_v48 = vrot.slane %v2121_v55, 1  ;;  %v2129_v51 = vrot.slane %v2128_v54, 2  ;;  %v2136_v21 = vrot.slane %v2135_v41, 4  ;;  %3437 = vpow2.f32 %v2073_v49  ;;  %v4221_v12 = vpop.f32.mrb[28].mxu0 }
 0x6b5   :  { %v4223_v50 = vpop.eup %3429  ;;  %v2142_v17 = vsel %vm350_vm1, %v4219_v47, 0.0  ;;  %v2075_v19 = vmul.f32 1.442695, %v2031_v1  ;;  %v2077_v0 = vmul.f32 1.442695, %v2032_v38  ;;  %v1945_v26 = vrot.slane %v1944_v20, 1  ;;  %v4257_v1 = vpop.permute.xlu1 %2311 }
 0x6b6   :  { %v2123_v42 = vadd.f32 %v2122_v48, %v2121_v55  ;;  %v2130_v28 = vadd.f32 %v2129_v51, %v2128_v54  ;;  %v2137_v4 = vadd.f32 %v2136_v21, %v2135_v41  ;;  %v2143_v59 = vsel %vm350_vm1, %v4223_v50, 0.0  ;;  %v4229_v34 = vpop.f32.mrb[29].mxu0 }
 0x6b7   :  { %v2144_v63 = vadd.f32 %v2143_v59, %v2142_v17  ;;  %3439 = vpow2.f32 %v2075_v19  ;;  %v1946_v57 = vmax.f32 %v1944_v20, %v1945_v26  ;;  %v1949_v3 = vmax.f32 %v1947_v8, %v1948_v14 }
 0x6b8   :  { %v4231_v23 = vpop.eup %3431  ;;  %3441 = vrcp.f32 %v2123_v42  ;;  %v2131_v5 = vrot.slane %v2130_v28, 1  ;;  %v2138_v39 = vrot.slane %v2137_v4, 2  ;;  %v1957_v36 = vsel %vm350_vm1, %v4195_v46, -inf  ;;  %v4235_v43 = vpop.f32.mrb[30].mxu0 }
 0x6b9   :  { %v4237_v62 = vpop.eup %3433  ;;  %v2145_v61 = vrot.slane %v2144_v63, 4  ;;  %v2151_v44 = vsel %vm350_vm1, %v4231_v23, 0.0  ;;  %3443 = vpow2.f32 %v2077_v0  ;;  %v2033_v9 = vsub.f32 %v4167_v33, %v1946_v57  ;;  %v4242_v13 = vpop.f32.mrb[31].mxu0 }
 0x6ba   :  { %v2132_v14 = vadd.f32 %v2131_v5, %v2130_v28  ;;  %v2139_v6 = vadd.f32 %v2138_v39, %v2137_v4  ;;  %v2152_v37 = vsel %vm350_vm1, %v4237_v62, 0.0  ;;  %v2034_v11 = vsub.f32 %v4163_v32, %v1946_v57 }
 0x6bb   :  { %v2146_v10 = vadd.f32 %v2145_v61, %v2144_v63  ;;  %v2153_v40 = vadd.f32 %v2152_v37, %v2151_v44  ;;  %v2079_v45 = vmul.f32 1.442695, %v2033_v9  ;;  %v1950_v27 = vrot.slane %v1949_v3, 4 }
 0x6bc   :  { %3445 = vrcp.f32 %v2132_v14  ;;  %v2140_v53 = vrot.slane %v2139_v6, 1  ;;  %v2081_v16 = vmul.f32 1.442695, %v2034_v11  ;;  %v1956_v49 = vsel %vm350_vm1, %v4199_v24, -inf  ;;  %v4249_v33 = vpop.f32.mrb[32].mxu0 }
 0x6bd   :  { %v4251_v31 = vpop.eup %3435  ;;  %v2147_v55 = vrot.slane %v2146_v10, 2  ;;  %v2154_v54 = vrot.slane %v2153_v40, 4  ;;  %3447 = vpow2.f32 %v2079_v45  ;;  %v1951_v41 = vmax.f32 %v1949_v3, %v1950_v27  ;;  %v4253_v20 = vpop.f32.mrb[33].mxu0 }
 0x6be   :  { %v4255_v32 = vpop.eup %3437  ;;  %v2141_v38 = vadd.f32 %v2140_v53, %v2139_v6  ;;  %v2160_v8 = vsel %vm350_vm1, %v4251_v31, 0.0  ;;  %3449 = vpow2.f32 %v2081_v16  ;;  %v1958_v48 = vmax.f32 %v1956_v49, %v1957_v36 }
 0x6bf   :  { %v2148_v51 = vadd.f32 %v2147_v55, %v2146_v10  ;;  %v2155_v21 = vadd.f32 %v2154_v54, %v2153_v40  ;;  %v2161_v17 = vsel %vm350_vm1, %v4255_v32, 0.0  ;;  %v1952_v19 = vrot.slane %v1951_v41, 2  ;;  %v4281_v40 = vpop.permute.xlu1 %2313 }
 0x6c0   :  { %3451 = vrcp.f32 %v2141_v38  ;;  %v2162_v0 = vadd.f32 %v2161_v17, %v2160_v8  ;;  %v1959_v26 = vrot.slane %v1958_v48, 4  ;;  %v1966_v42 = vsel %vm350_vm1, %v4209_v58, -inf  ;;  %v4265_v28 = vpop.f32.mrb[34].mxu0 }
 0x6c1   :  { %v4267_v4 = vpop.eup %3439  ;;  %v2149_v59 = vrot.slane %v2148_v51, 1  ;;  %v2156_v63 = vrot.slane %v2155_v21, 2  ;;  %v1953_v57 = vmax.f32 %v1951_v41, %v1952_v19  ;;  %v1965_v3 = vsel %vm350_vm1, %v4213_v30, -inf  ;;  %v4271_v5 = vpop.f32.mrb[35].mxu0 }
 0x6c2   :  { %v3442_v39 = vpop.eup %3441  ;;  %v2163_v36 = vrot.slane %v2162_v0, 4  ;;  %v2169_v61 = vsel %vm350_vm1, %v4267_v4, 0.0  ;;  %v1960_v44 = vmax.f32 %v1958_v48, %v1959_v26  ;;  %v4275_v9 = vmax.f32 %v1965_v3, %v1966_v42 }
 0x6c3   :  { %v4277_v14 = vpop.eup %3443  ;;  %v2260_v6 = vmul.f32 %v3442_v39, %v4171_v2  ;;  %v2261_v37 = vmul.f32 %v3442_v39, %v4175_v56  ;;  %v2150_v11 = vadd.f32 %v2149_v59, %v2148_v51  ;;  %v2157_v10 = vadd.f32 %v2156_v63, %v2155_v21 }
 0x6c4   :  { %v2164_v45 = vadd.f32 %v2163_v36, %v2162_v0  ;;  %v2170_v27 = vsel %vm350_vm1, %v4277_v14, 0.0  ;;  %v1954_v53 = vrot.slane %v1953_v57, 1  ;;  %v1961_v16 = vrot.slane %v1960_v44, 2  ;;  %v4285_v49 = vpop.f32.mrb[36].mxu0 }
 0x6c5   :  { %v2323_v55 = vmul.f32 %v4257_v1, %v2260_v6  ;;  %v2324_v54 = vmul.f32 %v4281_v40, %v2261_v37  ;;  %3453 = vrcp.f32 %v2150_v11  ;;  %v2158_v2 = vrot.slane %v2157_v10, 1  ;;  %v4289_v41 = vpop.f32.mrb[37].mxu0 }
 0x6c6   :  { %v3446_v56 = vpop.eup %3445  ;;  %v2165_v38 = vrot.slane %v2164_v45, 2  ;;  %v2171_v8 = vadd.f32 %v2170_v27, %v2169_v61  ;;  %v1955_v48 = vmax.f32 %v1953_v57, %v1954_v53  ;;  %v4291_v51 = vmax.f32 %v1960_v44, %v1961_v16 }
 0x6c7   :  { %v4293_v21 = vpop.eup %3447  ;;  %v2355_v17 = vsel %vm350_vm1, %v2323_v55, 0.0  ;;  %v2356_v19 = vsel %vm350_vm1, %v2324_v54, 0.0  ;;  %v2263_v0 = vmul.f32 %v3446_v56, %v4187_v22  ;;  %v2264_v26 = vmul.f32 %v3446_v56, %v4189_v7 }
 0x6c8   :  { %v4299_v42 = vpop.eup %3449  ;;  %v2357_v59 = vadd.f32 %v2356_v19, %v2355_v17  ;;  %v2159_v63 = vadd.f32 %v2158_v2, %v2157_v10  ;;  %v2166_v3 = vadd.f32 %v2165_v38, %v2164_v45  ;;  %v2172_v39 = vrot.slane %v2171_v8, 4 }
 0x6c9   :  { %v2325_v57 = vmul.f32 %v4257_v1, %v2263_v0  ;;  %v2326_v36 = vmul.f32 %v4281_v40, %v2264_v26  ;;  %v2178_v61 = vsel %vm350_vm1, %v4293_v21, 0.0  ;;  %v2179_v44 = vsel %vm350_vm1, %v4299_v42, 0.0 }
 0x6ca   :  { %v3452_v6 = vpop.eup %3451  ;;  %v2358_v22 = vrot.slane %v2357_v59, 4  ;;  %3455 = vrcp.f32 %v2159_v63  ;;  %v2167_v7 = vrot.slane %v2166_v3, 1  ;;  %v2173_v37 = vadd.f32 %v2172_v39, %v2171_v8 }
 0x6cb   :  { %v2364_v11 = vsel %vm350_vm1, %v2325_v57, 0.0  ;;  %v2365_v10 = vsel %vm350_vm1, %v2326_v36, 0.0  ;;  %v2266_v45 = vmul.f32 %v3452_v6, %v4201_v15  ;;  %v2267_v27 = vmul.f32 %v3452_v6, %v4205_v25 }
 0x6cc   :  { %v2359_v53 = vadd.f32 %v2358_v22, %v2357_v59  ;;  %v2366_v16 = vadd.f32 %v2365_v10, %v2364_v11  ;;  %v2168_v55 = vadd.f32 %v2167_v7, %v2166_v3  ;;  %v2174_v54 = vrot.slane %v2173_v37, 2 }
 0x6cd   :  { %v2327_v2 = vmul.f32 %v4257_v1, %v2266_v45  ;;  %v2328_v56 = vmul.f32 %v4281_v40, %v2267_v27  ;;  %v2180_v38 = vadd.f32 %v2179_v44, %v2178_v61  ;;  %v2035_v17 = vsub.f32 %v4183_v18, %v1955_v48 }
 0x6ce   :  { %v2360_v8 = vrot.slane %v2359_v53, 2  ;;  %v2367_v19 = vrot.slane %v2366_v16, 4  ;;  %3457 = vrcp.f32 %v2168_v55  ;;  %v2175_v0 = vadd.f32 %v2174_v54, %v2173_v37 }
 0x6cf   :  { %v3454_v26 = vpop.eup %3453  ;;  %v2373_v15 = vsel %vm350_vm1, %v2327_v2, 0.0  ;;  %v2374_v25 = vsel %vm350_vm1, %v2328_v56, 0.0  ;;  %v2181_v59 = vrot.slane %v2180_v38, 4  ;;  %v2036_v63 = vsub.f32 %v4179_v35, %v1955_v48 }
 0x6d0   :  { %v4317_v3 = vadd.f32 %v2360_v8, %v2359_v53  ;;  %v2368_v39 = vadd.f32 %v2367_v19, %v2366_v16  ;;  %v2375_v57 = vadd.f32 %v2374_v25, %v2373_v15  ;;  %v2269_v36 = vmul.f32 %v3454_v26, %v4219_v47 }
 0x6d1   :  { %v2270_v18 = vmul.f32 %v3454_v26, %v4223_v50  ;;  %v2176_v61 = vrot.slane %v2175_v0, 1  ;;  %v2182_v44 = vadd.f32 %v2181_v59, %v2180_v38  ;;  %v2083_v6 = vmul.f32 1.442695, %v2035_v17 }
 0x6d2   :  { %v2369_v22 = vrot.slane %v2368_v39, 2  ;;  %v2376_v7 = vrot.slane %v2375_v57, 4  ;;  %v2329_v37 = vmul.f32 %v4257_v1, %v2269_v36  ;;  %v2085_v11 = vmul.f32 1.442695, %v2036_v63 }
 0x6d3   :  { %v2330_v10 = vmul.f32 %v4281_v40, %v2270_v18  ;;  %v2177_v45 = vadd.f32 %v2176_v61, %v2175_v0  ;;  %v2183_v35 = vrot.slane %v2182_v44, 2  ;;  %3459 = vpow2.f32 %v2083_v6 }
 0x6d4   :  { %v3456_v48 = vpop.eup %3455  ;;  %v4323_v27 = vadd.f32 %v2369_v22, %v2368_v39  ;;  %v4325_v53 = vadd.f32 %v2376_v7, %v2375_v57  ;;  %v2382_v47 = vsel %vm350_vm1, %v2329_v37, 0.0  ;;  %3461 = vpow2.f32 %v2085_v11 }
 0x6d5   :  { %v2383_v50 = vsel %vm350_vm1, %v2330_v10, 0.0  ;;  %v2272_v16 = vmul.f32 %v3456_v48, %v4231_v23  ;;  %v2273_v55 = vmul.f32 %v3456_v48, %v4237_v62  ;;  %3463 = vrcp.f32 %v2177_v45 }
 0x6d6   :  { %v2378_v54 = vrot.slane %v4325_v53, 2  ;;  %v2384_v2 = vadd.f32 %v2383_v50, %v2382_v47  ;;  %v2184_v56 = vadd.f32 %v2183_v35, %v2182_v44  ;;  %v1963_v38 = vrot.slane %v4291_v51, 1 }
 0x6d7   :  { %v2331_v17 = vmul.f32 %v4257_v1, %v2272_v16  ;;  %v2332_v8 = vmul.f32 %v4281_v40, %v2273_v55  ;;  %v1968_v19 = vrot.slane %v4275_v9, 4  ;;  %v1975_v0 = vsel %vm350_vm1, %v4221_v12, -inf }
 0x6d8   :  { %v3458_v26 = vpop.eup %3457  ;;  %v2385_v23 = vrot.slane %v2384_v2, 4  ;;  %v2185_v15 = vrot.slane %v2184_v56, 1  ;;  %v1964_v62 = vmax.f32 %v4291_v51, %v1963_v38  ;;  %v1974_v25 = vsel %vm350_vm1, %v4229_v34, -inf }
 0x6d9   :  { %v2391_v59 = vsel %vm350_vm1, %v2331_v17, 0.0  ;;  %v2392_v63 = vsel %vm350_vm1, %v2332_v8, 0.0  ;;  %v2275_v39 = vmul.f32 %v3458_v26, %v4251_v31  ;;  %v2276_v57 = vmul.f32 %v3458_v26, %v4255_v32 }
 0x6da   :  { %v4345_v36 = vadd.f32 %v2385_v23, %v2384_v2  ;;  %v4347_v18 = vadd.f32 %v2392_v63, %v2391_v59  ;;  %v2186_v61 = vadd.f32 %v2185_v15, %v2184_v56  ;;  %v2037_v44 = vsub.f32 %v4199_v24, %v1964_v62 }
 0x6db   :  { %v2333_v51 = vmul.f32 %v4257_v1, %v2275_v39  ;;  %v4352_v6 = vmul.f32 %v4281_v40, %v2276_v57  ;;  %v2038_v22 = vsub.f32 %v4195_v46, %v1964_v62  ;;  %v1969_v7 = vmax.f32 %v4275_v9, %v1968_v19 }
 0x6dc   :  { %3465 = vrcp.f32 %v2186_v61  ;;  %v2087_v31 = vmul.f32 1.442695, %v2037_v44  ;;  %v1976_v37 = vmax.f32 %v1974_v25, %v1975_v0  ;;  %v1984_v32 = vsel %vm350_vm1, %v4235_v43, -inf }
 0x6dd   :  { %v4358_v11 = vpop.eup %3459  ;;  %v4361_v10 = vsel %vm350_vm1, %v2333_v51, 0.0  ;;  %v2089_v24 = vmul.f32 1.442695, %v2038_v22  ;;  %v1970_v45 = vrot.slane %v1969_v7, 2  ;;  %v1983_v35 = vsel %vm350_vm1, %v4242_v13, -inf }
 0x6de   :  { %v4365_v48 = vpop.eup %3461  ;;  %v2187_v46 = vsel %vm350_vm1, %v4358_v11, 0.0  ;;  %3467 = vpow2.f32 %v2087_v31  ;;  %v1977_v9 = vrot.slane %v1976_v37, 4  ;;  %v1985_v47 = vmax.f32 %v1983_v35, %v1984_v32 }
 0x6df   :  { %v3464_v50 = vpop.eup %3463  ;;  %v2188_v16 = vsel %vm350_vm1, %v4365_v48, 0.0  ;;  %3469 = vpow2.f32 %v2089_v24  ;;  %v1971_v55 = vmax.f32 %v1969_v7, %v1970_v45  ;;  %v1993_v2 = vsel %vm350_vm1, %v4249_v33, -inf }
 0x6e0   :  { %v2278_v56 = vmul.f32 %v3464_v50, %v4267_v4  ;;  %v2279_v38 = vmul.f32 %v3464_v50, %v4277_v14  ;;  %v2189_v17 = vadd.f32 %v2188_v16, %v2187_v46  ;;  %v1978_v8 = vmax.f32 %v1976_v37, %v1977_v9 }
 0x6e1   :  { %v1972_v19 = vrot.slane %v1971_v55, 1  ;;  %v1986_v0 = vrot.slane %v1985_v47, 4  ;;  %v1992_v26 = vsel %vm350_vm1, %v4253_v20, -inf  ;;  %v2002_v23 = vsel %vm350_vm1, %v4265_v28, -inf }
 0x6e2   :  { %v4380_v15 = vmul.f32 %v4257_v1, %v2278_v56  ;;  %v2190_v62 = vrot.slane %v2189_v17, 4  ;;  %v1979_v25 = vrot.slane %v1978_v8, 2  ;;  %v1994_v59 = vmax.f32 %v1992_v26, %v1993_v2 }
 0x6e3   :  { %v1973_v63 = vmax.f32 %v1971_v55, %v1972_v19  ;;  %v1987_v4 = vmax.f32 %v1985_v47, %v1986_v0  ;;  %v2001_v14 = vsel %vm350_vm1, %v4271_v5, -inf  ;;  %v2011_v39 = vsel %vm350_vm1, %v4285_v49, -inf }
 0x6e4   :  { %v2191_v57 = vadd.f32 %v2190_v62, %v2189_v17  ;;  %v1980_v61 = vmax.f32 %v1978_v8, %v1979_v25  ;;  %v1995_v44 = vrot.slane %v1994_v59, 4  ;;  %v2003_v51 = vmax.f32 %v2001_v14, %v2002_v23 }
 0x6e5   :  { %v2039_v22 = vsub.f32 %v4213_v30, %v1973_v63  ;;  %v2040_v7 = vsub.f32 %v4209_v58, %v1973_v63  ;;  %v1988_v31 = vrot.slane %v1987_v4, 2  ;;  %v2010_v37 = vsel %vm350_vm1, %v4289_v41, -inf }
 0x6e6   :  { %v3466_v32 = vpop.eup %3465  ;;  %v2192_v24 = vrot.slane %v2191_v57, 2  ;;  %v1981_v45 = vrot.slane %v1980_v61, 1  ;;  %v1996_v35 = vmax.f32 %v1994_v59, %v1995_v44  ;;  %v2004_v46 = vrot.slane %v2003_v51, 4 }
 0x6e7   :  { %v2281_v9 = vmul.f32 %v3466_v32, %v4293_v21  ;;  %v2282_v47 = vmul.f32 %v3466_v32, %v4299_v42  ;;  %v2091_v50 = vmul.f32 1.442695, %v2039_v22  ;;  %v2093_v16 = vmul.f32 1.442695, %v2040_v7 }
 0x6e8   :  { %v4392_v55 = vpop.eup %3467  ;;  %v2193_v30 = vadd.f32 %v2192_v24, %v2191_v57  ;;  %v1982_v2 = vmax.f32 %v1980_v61, %v1981_v45  ;;  %v1989_v58 = vmax.f32 %v1987_v4, %v1988_v31  ;;  %v1997_v56 = vrot.slane %v1996_v35, 2 }
 0x6e9   :  { %v4394_v17 = vpop.eup %3469  ;;  %v4397_v8 = vmul.f32 %v4257_v1, %v2281_v9  ;;  %v2196_v19 = vsel %vm350_vm1, %v4392_v55, 0.0  ;;  %3471 = vpow2.f32 %v2091_v50  ;;  %v2005_v21 = vmax.f32 %v2003_v51, %v2004_v46 }
 0x6ea   :  { %v2194_v0 = vrot.slane %v2193_v30, 1  ;;  %v2197_v42 = vsel %vm350_vm1, %v4394_v17, 0.0  ;;  %3473 = vpow2.f32 %v2093_v16  ;;  %v2041_v26 = vsub.f32 %v4229_v34, %v1982_v2 }
 0x6eb   :  { %v2198_v23 = vadd.f32 %v2197_v42, %v2196_v19  ;;  %v2042_v62 = vsub.f32 %v4221_v12, %v1982_v2  ;;  %v1990_v25 = vrot.slane %v1989_v58, 1  ;;  %v1998_v59 = vmax.f32 %v1996_v35, %v1997_v56 }
 0x6ec   :  { %v2195_v63 = vadd.f32 %v2194_v0, %v2193_v30  ;;  %v2095_v1 = vmul.f32 1.442695, %v2041_v26  ;;  %v2006_v4 = vrot.slane %v2005_v21, 2  ;;  %v2012_v14 = vmax.f32 %v2010_v37, %v2011_v39 }
 0x6ed   :  { %v2199_v57 = vrot.slane %v2198_v23, 4  ;;  %v2097_v61 = vmul.f32 1.442695, %v2042_v62  ;;  %v1991_v44 = vmax.f32 %v1989_v58, %v1990_v25  ;;  %v1999_v51 = vrot.slane %v1998_v59, 1 }
 0x6ee   :  { %3475 = vrcp.f32 %v2195_v63  ;;  %v2007_v22 = vmax.f32 %v2005_v21, %v2006_v4  ;;  %v2013_v7 = vrot.slane %v2012_v14, 4  ;;  %v4406_v31 = vmul.f32 %v4281_v40, %v2279_v38 }
 0x6ef   :  { %v2200_v34 = vadd.f32 %v2199_v57, %v2198_v23  ;;  %3477 = vpow2.f32 %v2095_v1  ;;  %v2043_v12 = vsub.f32 %v4242_v13, %v1991_v44  ;;  %v2044_v32 = vsub.f32 %v4235_v43, %v1991_v44 }
 0x6f0   :  { %3479 = vpow2.f32 %v2097_v61  ;;  %v2000_v24 = vmax.f32 %v1998_v59, %v1999_v51  ;;  %v2008_v45 = vrot.slane %v2007_v22, 1  ;;  %v2014_v39 = vmax.f32 %v2012_v14, %v2013_v7  ;;  %v4443_v51 = vpop.permute.xlu1 %2317 }
 0x6f1   :  { %v2201_v37 = vrot.slane %v2200_v34, 2  ;;  %v2099_v35 = vmul.f32 1.442695, %v2043_v12  ;;  %v2101_v46 = vmul.f32 1.442695, %v2044_v32  ;;  %v4411_v9 = vmul.f32 %v4281_v40, %v2282_v47 }
 0x6f2   :  { %v2045_v50 = vsub.f32 %v4253_v20, %v2000_v24  ;;  %v2046_v38 = vsub.f32 %v4249_v33, %v2000_v24  ;;  %v2009_v16 = vmax.f32 %v2007_v22, %v2008_v45  ;;  %v2015_v30 = vrot.slane %v2014_v39, 2  ;;  %v4445_v22 = vpop.permute.xlu0 %2315 }
 0x6f3   :  { %v4415_v2 = vpop.eup %3471  ;;  %v2202_v13 = vadd.f32 %v2201_v37, %v2200_v34  ;;  %3481 = vpow2.f32 %v2099_v35  ;;  %v2362_v43 = vrot.slane %v4317_v3, 1  ;;  %v2371_v58 = vrot.slane %v4323_v27, 1 }
 0x6f4   :  { %v4419_v56 = vpop.eup %3473  ;;  %v2205_v40 = vsel %vm350_vm1, %v4415_v2, 0.0  ;;  %3483 = vpow2.f32 %v2101_v46  ;;  %v2103_v47 = vmul.f32 1.442695, %v2045_v50  ;;  %v2105_v20 = vmul.f32 1.442695, %v2046_v38 }
 0x6f5   :  { %v2203_v19 = vrot.slane %v2202_v13, 1  ;;  %v2206_v33 = vsel %vm350_vm1, %v4419_v56, 0.0  ;;  %v2047_v21 = vsub.f32 %v4271_v5, %v2009_v16  ;;  %v2048_v0 = vsub.f32 %v4265_v28, %v2009_v16 }
 0x6f6   :  { %v2207_v42 = vadd.f32 %v2206_v33, %v2205_v40  ;;  %3485 = vpow2.f32 %v2103_v47  ;;  %v2016_v26 = vmax.f32 %v2014_v39, %v2015_v30  ;;  %v4428_v23 = vadd.f32 %v2362_v43, %v4317_v3 }
 0x6f7   :  { %v2204_v62 = vadd.f32 %v2203_v19, %v2202_v13  ;;  %3487 = vpow2.f32 %v2105_v20  ;;  %v2107_v25 = vmul.f32 1.442695, %v2047_v21  ;;  %v2109_v59 = vmul.f32 1.442695, %v2048_v0 }
 0x6f8   :  { %v3476_v63 = vpop.eup %3475  ;;  %v2208_v1 = vrot.slane %v2207_v42, 4  ;;  %v2017_v4 = vrot.slane %v2016_v26, 1  ;;  %v4431_v14 = vadd.f32 %v2371_v58, %v4323_v27  ;;  %v2379_v28 = vadd.f32 %v2378_v54, %v4325_v53 }
 0x6f9   :  { %v4436_v5 = vpop.eup %3477  ;;  %v2284_v57 = vmul.f32 %v3476_v63, %v4358_v11  ;;  %v2285_v3 = vmul.f32 %v3476_v63, %v4365_v48  ;;  %3489 = vrcp.f32 %v2204_v62  ;;  %v2387_v61 = vrot.slane %v4345_v36, 2 }
 0x6fa   :  { %v4441_v44 = vpop.eup %3479  ;;  %v2209_v27 = vadd.f32 %v2208_v1, %v2207_v42  ;;  %v2214_v7 = vsel %vm350_vm1, %v4436_v5, 0.0  ;;  %3491 = vpow2.f32 %v2107_v25  ;;  %v2018_v53 = vmax.f32 %v2016_v26, %v2017_v4 }
 0x6fb   :  { %v2339_v54 = vmul.f32 %v4445_v22, %v2284_v57  ;;  %v2340_v11 = vmul.f32 %v4443_v51, %v2285_v3  ;;  %v2215_v48 = vsel %vm350_vm1, %v4441_v44, 0.0  ;;  %3493 = vpow2.f32 %v2109_v59 }
 0x6fc   :  { %v2210_v34 = vrot.slane %v2209_v27, 2  ;;  %v2216_v12 = vadd.f32 %v2215_v48, %v2214_v7  ;;  %v2049_v32 = vsub.f32 %v4289_v41, %v2018_v53  ;;  %v2050_v24 = vsub.f32 %v4285_v49, %v2018_v53 }
 0x6fd   :  { %v4455_v45 = vpop.eup %3481  ;;  %v2427_v39 = vsel %vm350_vm1, %v2339_v54, 0.0  ;;  %v2428_v37 = vsel %vm350_vm1, %v2340_v11, 0.0  ;;  %v2380_v35 = vrot.slane %v2379_v28, 1  ;;  %v2388_v46 = vadd.f32 %v2387_v61, %v4345_v36 }
 0x6fe   :  { %v4460_v50 = vpop.eup %3483  ;;  %v2429_v38 = vadd.f32 %v2428_v37, %v2427_v39  ;;  %v2211_v16 = vadd.f32 %v2210_v34, %v2209_v27  ;;  %v2217_v30 = vrot.slane %v2216_v12, 4  ;;  %v2223_v13 = vsel %vm350_vm1, %v4455_v45, 0.0 }
 0x6ff   :  { %v2224_v49 = vsel %vm350_vm1, %v4460_v50, 0.0  ;;  %v2111_v41 = vmul.f32 1.442695, %v2049_v32  ;;  %v2113_v43 = vmul.f32 1.442695, %v2050_v24  ;;  %v4466_v58 = vadd.f32 %v2380_v35, %v2379_v28 }
 0x700   :  { %v4468_v40 = vpop.eup %3485  ;;  %v2430_v47 = vrot.slane %v2429_v38, 4  ;;  %v2212_v20 = vrot.slane %v2211_v16, 1  ;;  %v2218_v36 = vadd.f32 %v2217_v30, %v2216_v12  ;;  %v2225_v19 = vadd.f32 %v2224_v49, %v2223_v13 }
 0x701   :  { %v4470_v33 = vpop.eup %3487  ;;  %v2232_v21 = vsel %vm350_vm1, %v4468_v40, 0.0  ;;  %3495 = vpow2.f32 %v2111_v41  ;;  %v2389_v0 = vrot.slane %v2388_v46, 1  ;;  %v2394_v42 = vrot.slane %v4347_v18, 4 }
 0x702   :  { %v2431_v26 = vadd.f32 %v2430_v47, %v2429_v38  ;;  %v2213_v62 = vadd.f32 %v2212_v20, %v2211_v16  ;;  %v2219_v25 = vrot.slane %v2218_v36, 2  ;;  %v2226_v59 = vrot.slane %v2225_v19, 4 }
 0x703   :  { %v3490_v63 = vpop.eup %3489  ;;  %v2233_v1 = vsel %vm350_vm1, %v4470_v33, 0.0  ;;  %3497 = vpow2.f32 %v2113_v43  ;;  %v4477_v4 = vadd.f32 %v2389_v0, %v2388_v46  ;;  %v2395_v28 = vadd.f32 %v2394_v42, %v4347_v18 }
 0x704   :  { %v4480_v57 = vpop.eup %3491  ;;  %v2432_v3 = vrot.slane %v2431_v26, 2  ;;  %v2287_v61 = vmul.f32 %v3490_v63, %v4392_v55  ;;  %v2288_v27 = vmul.f32 %v3490_v63, %v4394_v17  ;;  %3499 = vrcp.f32 %v2213_v62 }
 0x705   :  { %v4484_v7 = vpop.eup %3493  ;;  %v2220_v53 = vadd.f32 %v2219_v25, %v2218_v36  ;;  %v2227_v54 = vadd.f32 %v2226_v59, %v2225_v19  ;;  %v2234_v11 = vadd.f32 %v2233_v1, %v2232_v21  ;;  %v2241_v48 = vsel %vm350_vm1, %v4480_v57, 0.0 }
 0x706   :  { %v4488_v34 = vadd.f32 %v2432_v3, %v2431_v26  ;;  %v2341_v18 = vmul.f32 %v4445_v22, %v2287_v61  ;;  %v2342_v12 = vmul.f32 %v4443_v51, %v2288_v27  ;;  %v2242_v55 = vsel %vm350_vm1, %v4484_v7, 0.0 }
 0x707   :  { %v2221_v32 = vrot.slane %v2220_v53, 1  ;;  %v2228_v17 = vrot.slane %v2227_v54, 2  ;;  %v2235_v24 = vrot.slane %v2234_v11, 4  ;;  %v2243_v39 = vadd.f32 %v2242_v55, %v2241_v48 }
 0x708   :  { %v2434_v37 = vrot.slane %v4488_v34, 1  ;;  %v2436_v35 = vsel %vm350_vm1, %v2341_v18, 0.0  ;;  %v2437_v46 = vsel %vm350_vm1, %v2342_v12, 0.0  ;;  %v2396_v38 = vrot.slane %v2395_v28, 2 }
 0x709   :  { %v2438_v16 = vadd.f32 %v2437_v46, %v2436_v35  ;;  %v2222_v30 = vadd.f32 %v2221_v32, %v2220_v53  ;;  %v2229_v13 = vadd.f32 %v2228_v17, %v2227_v54  ;;  %v2236_v49 = vadd.f32 %v2235_v24, %v2234_v11 }
 0x70a   :  { %v2244_v41 = vrot.slane %v2243_v39, 4  ;;  %v2397_v43 = vadd.f32 %v2396_v38, %v2395_v28  ;;  %v2401_v47 = vsel %vm350_vm1, %v4352_v6, 0.0  ;;  %v2409_v20 = vsel %vm350_vm1, %v4380_v15, 0.0 }
 0x70b   :  { %v4501_v36 = vpop.eup %3495  ;;  %v2439_v19 = vrot.slane %v2438_v16, 4  ;;  %3501 = vrcp.f32 %v2222_v30  ;;  %v2230_v21 = vrot.slane %v2229_v13, 1  ;;  %v2237_v0 = vrot.slane %v2236_v49, 2 }
 0x70c   :  { %v2245_v42 = vadd.f32 %v2244_v41, %v2243_v39  ;;  %v2250_v26 = vsel %vm350_vm1, %v4501_v36, 0.0  ;;  %v2398_v62 = vrot.slane %v2397_v43, 1  ;;  %v2402_v25 = vadd.f32 %v2401_v47, %v4361_v10 }
 0x70d   :  { %v4506_v59 = vpop.eup %3497  ;;  %v2440_v63 = vadd.f32 %v2439_v19, %v2438_v16  ;;  %v2231_v6 = vadd.f32 %v2230_v21, %v2229_v13  ;;  %v2238_v1 = vadd.f32 %v2237_v0, %v2236_v49  ;;  %v2410_v15 = vsel %vm350_vm1, %v4406_v31, 0.0 }
 0x70e   :  { %v3500_v28 = vpop.eup %3499  ;;  %v2246_v3 = vrot.slane %v2245_v42, 2  ;;  %v2251_v61 = vsel %vm350_vm1, %v4506_v59, 0.0  ;;  %v4512_v27 = vadd.f32 %v2398_v62, %v2397_v43  ;;  %v2403_v53 = vrot.slane %v2402_v25, 4 }
 0x70f   :  { %v2441_v54 = vrot.slane %v2440_v63, 2  ;;  %v2290_v11 = vmul.f32 %v3500_v28, %v4415_v2  ;;  %v2291_v10 = vmul.f32 %v3500_v28, %v4419_v56  ;;  %3503 = vrcp.f32 %v2231_v6 }
 0x710   :  { %v2239_v48 = vrot.slane %v2238_v1, 1  ;;  %v2247_v18 = vadd.f32 %v2246_v3, %v2245_v42  ;;  %v2252_v12 = vadd.f32 %v2251_v61, %v2250_v26  ;;  %v2404_v55 = vadd.f32 %v2403_v53, %v2402_v25 }
 0x711   :  { %v4516_v32 = vadd.f32 %v2441_v54, %v2440_v63  ;;  %v2343_v31 = vmul.f32 %v4445_v22, %v2290_v11  ;;  %v2344_v17 = vmul.f32 %v4443_v51, %v2291_v10  ;;  %v2411_v24 = vadd.f32 %v2410_v15, %v2409_v20 }
 0x712   :  { %v2240_v39 = vadd.f32 %v2239_v48, %v2238_v1  ;;  %v2248_v35 = vrot.slane %v2247_v18, 1  ;;  %v2253_v46 = vrot.slane %v2252_v12, 4  ;;  %v2405_v38 = vrot.slane %v2404_v55, 2 }
 0x713   :  { %v2443_v2 = vrot.slane %v4516_v32, 1  ;;  %v2445_v56 = vsel %vm350_vm1, %v2343_v31, 0.0  ;;  %v2446_v16 = vsel %vm350_vm1, %v2344_v17, 0.0  ;;  %v2412_v30 = vrot.slane %v2411_v24, 4 }
 0x714   :  { %v2447_v13 = vadd.f32 %v2446_v16, %v2445_v56  ;;  %3505 = vrcp.f32 %v2240_v39  ;;  %v2249_v49 = vadd.f32 %v2248_v35, %v2247_v18  ;;  %v2254_v41 = vadd.f32 %v2253_v46, %v2252_v12 }
 0x715   :  { %v3502_v43 = vpop.eup %3501  ;;  %v2406_v47 = vadd.f32 %v2405_v38, %v2404_v55  ;;  %v2413_v19 = vadd.f32 %v2412_v30, %v2411_v24  ;;  %v2418_v20 = vsel %vm350_vm1, %v4397_v8, 0.0  ;;  %v2419_v21 = vsel %vm350_vm1, %v4411_v9, 0.0 }
 0x716   :  { %v2448_v0 = vrot.slane %v2447_v13, 4  ;;  %v2293_v42 = vmul.f32 %v3502_v43, %v4436_v5  ;;  %v2294_v26 = vmul.f32 %v3502_v43, %v4441_v44  ;;  %3507 = vrcp.f32 %v2249_v49 }
 0x717   :  { %v2255_v62 = vrot.slane %v2254_v41, 2  ;;  %v2407_v25 = vrot.slane %v2406_v47, 1  ;;  %v2414_v63 = vrot.slane %v2413_v19, 2  ;;  %v2420_v6 = vadd.f32 %v2419_v21, %v2418_v20 }
 0x718   :  { %v2449_v1 = vadd.f32 %v2448_v0, %v2447_v13  ;;  %v2345_v15 = vmul.f32 %v4445_v22, %v2293_v42  ;;  %v2346_v28 = vmul.f32 %v4443_v51, %v2294_v26  ;;  %v2519_v8 = vsel %vm1002_vm2, %v4431_v14, %v4428_v23  ;;  %v31_v23 = vld [vmem:[%s4677_s3 + $0x40] sm:$0xff]  ;;  %v32_v14 = vld [vmem:[%s4677_s3 + $0x48] sm:$0xff] }
 0x719   :  { %v3504_v9 = vpop.eup %3503  ;;  %v2256_v3 = vadd.f32 %v2255_v62, %v2254_v41  ;;  %v2408_v61 = vadd.f32 %v2407_v25, %v2406_v47  ;;  %v2415_v5 = vadd.f32 %v2414_v63, %v2413_v19  ;;  %v2421_v53 = vrot.slane %v2420_v6, 4  ;;  %v33_v63 = vld [vmem:[%s4677_s3 + $0x50] sm:$0xff] }
 0x71a   :  { %v2450_v44 = vrot.slane %v2449_v1, 2  ;;  %v2454_v54 = vsel %vm350_vm1, %v2345_v15, 0.0  ;;  %v2455_v11 = vsel %vm350_vm1, %v2346_v28, 0.0  ;;  %v2296_v10 = vmul.f32 %v3504_v9, %v4455_v45 }
 0x71b   :  { %v2456_v48 = vadd.f32 %v2455_v11, %v2454_v54  ;;  %v2297_v18 = vmul.f32 %v3504_v9, %v4460_v50  ;;  %v2257_v12 = vrot.slane %v2256_v3, 1  ;;  %v2416_v55 = vrot.slane %v2415_v5, 1 }
 0x71c   :  { %v2451_v31 = vadd.f32 %v2450_v44, %v2449_v1  ;;  %v2347_v17 = vmul.f32 %v4445_v22, %v2296_v10  ;;  %v2422_v24 = vadd.f32 %v2421_v53, %v2420_v6  ;;  %v2520_v45 = vsel %vm1004_vm3, %v4466_v58, %v2519_v8 }
 0x71d   :  { %v2457_v39 = vrot.slane %v2456_v48, 4  ;;  %v2348_v50 = vmul.f32 %v4443_v51, %v2297_v18  ;;  %v2258_v35 = vadd.f32 %v2257_v12, %v2256_v3  ;;  %v2417_v46 = vadd.f32 %v2416_v55, %v2415_v5 }
 0x71e   :  { %v3506_v38 = vpop.eup %3505  ;;  %v2463_v56 = vsel %vm350_vm1, %v2347_v17, 0.0  ;;  %v2423_v16 = vrot.slane %v2422_v24, 2  ;;  %v2521_v30 = vsel %vm1006_vm4, %v4477_v4, %v2520_v45  ;;  %v3311_v13 = vpack.c.bf16 %v32_v14, %v31_v23 }
 0x71f   :  { %v2458_v49 = vadd.f32 %v2457_v39, %v2456_v48  ;;  %v2464_v41 = vsel %vm350_vm1, %v2348_v50, 0.0  ;;  %v2299_v43 = vmul.f32 %v3506_v38, %v4468_v40  ;;  %v2300_v58 = vmul.f32 %v3506_v38, %v4470_v33 }
 0x720   :  { %v3508_v47 = vpop.eup %3507  ;;  %v2465_v19 = vadd.f32 %v2464_v41, %v2463_v56  ;;  %3509 = vrcp.f32 %v2258_v35  ;;  %v2424_v20 = vadd.f32 %v2423_v16, %v2422_v24  ;;  %v2522_v21 = vsel %vm1008_vm5, %v4512_v27, %v2521_v30  ;;  %3312 = vmatprep.subr.bf16.mxu1 %v3311_v13  ;;  %v34_v27 = vld [vmem:[%s4677_s3 + $0x58] sm:$0xff] }
 0x721   :  { %v2459_v0 = vrot.slane %v2458_v49, 2  ;;  %v2349_v42 = vmul.f32 %v4445_v22, %v2299_v43  ;;  %v2350_v4 = vmul.f32 %v4443_v51, %v2300_v58  ;;  %v2302_v26 = vmul.f32 %v3508_v47, %v4480_v57  ;;  %3314 = vmatpush3.bf16.msra.mxu1 %v3311_v13 }
 0x722   :  { %v2466_v62 = vrot.slane %v2465_v19, 4  ;;  %v2303_v40 = vmul.f32 %v3508_v47, %v4484_v7  ;;  %v2425_v33 = vrot.slane %v2424_v20, 1  ;;  %v2523_v25 = vsel %vm1010_vm6, %v2408_v61, %v2522_v21 }
 0x723   :  { %v2472_v6 = vsel %vm350_vm1, %v2349_v42, 0.0  ;;  %v2473_v1 = vsel %vm350_vm1, %v2350_v4, 0.0  ;;  %v2351_v57 = vmul.f32 %v4445_v22, %v2302_v26  ;;  %v2524_v15 = vsel %vm1012_vm7, %v2417_v46, %v2523_v25  ;;  %v4600_v25 = vld [vmem:[%s4677_s3 + $0xc0] sm:$0xff] }
 0x724   :  { %v2467_v7 = vadd.f32 %v2466_v62, %v2465_v19  ;;  %v2474_v28 = vadd.f32 %v2473_v1, %v2472_v6  ;;  %v2352_v8 = vmul.f32 %v4443_v51, %v2303_v40  ;;  %v2426_v9 = vadd.f32 %v2425_v33, %v2424_v20 }
 0x725   :  { %v2481_v3 = vsel %vm350_vm1, %v2351_v57, 0.0  ;;  %v3315_v61 = vpack.c.bf16 %v34_v27, %v33_v63  ;;  %v2435_v5 = vadd.f32 %v2434_v37, %v4488_v34  ;;  %v2444_v53 = vadd.f32 %v2443_v2, %v4516_v32 }
 0x726   :  { %v2525_v44 = vsel %vm1014_vm8, %v2426_v9, %v2524_v15  ;;  %v2452_v54 = vrot.slane %v2451_v31, 1  ;;  %v2460_v11 = vadd.f32 %v2459_v0, %v2458_v49  ;;  %v2468_v10 = vrot.slane %v2467_v7, 2 }
 0x727   :  { %3214 = vmatprep.mubr.msk.f32.mxu1 %vm350_vm1, %v2525_v44  ;;  %3316 = vmatprep.subr.bf16.mxu1 %v3315_v61  ;;  %v2475_v48 = vrot.slane %v2474_v28, 4  ;;  %v2482_v18 = vsel %vm350_vm1, %v2352_v8, 0.0  ;;  %v2526_v12 = vsel %vm1002_vm2, %v2444_v53, %v2435_v5  ;;  %v2501_v33 = vsub.s32 1, %v3616_v29 }
 0x728   :  { %3318 = vmatpush3.bf16.msra.mxu1 %v3315_v61  ;;  %v2453_v55 = vadd.f32 %v2452_v54, %v2451_v31  ;;  %v2461_v34 = vrot.slane %v2460_v11, 1  ;;  %v2469_v37 = vadd.f32 %v2468_v10, %v2467_v7  ;;  %v2483_v23 = vadd.f32 %v2482_v18, %v2481_v3  ;;  %v2654_v18 = vld [vmem:[%s4678_s2 + $0x58] sm:$0xff] }
 0x729   :  { %v2476_v14 = vadd.f32 %v2475_v48, %v2474_v28  ;;  %v2502_v63 = vrot.slane %v4600_v25, %v2501_v33  ;;  %v2653_v48 = vld [vmem:[%s4678_s2 + $0x50] sm:$0xff] }
 0x72a   :  { %v3510_v32 = vpop.eup %3509  ;;  %v2462_v2 = vadd.f32 %v2461_v34, %v2460_v11  ;;  %v2470_v17 = vrot.slane %v2469_v37, 1  ;;  %v2484_v24 = vrot.slane %v2483_v23, 4  ;;  %v2527_v45 = vsel %vm1004_vm3, %v2453_v55, %v2526_v12  ;;  %v2655_v55 = vld [vmem:[%s4678_s2 + $0x60] sm:$0xff] }
 0x72b   :  { %v2305_v39 = vmul.f32 %v3510_v32, %v4501_v36  ;;  %v2306_v50 = vmul.f32 %v3510_v32, %v4506_v59  ;;  %v2477_v35 = vrot.slane %v2476_v14, 2  ;;  %v3323_v34 = vpack.c.bf16 %v2655_v55, %v2654_v18 }
 0x72c   :  { %v2471_v46 = vadd.f32 %v2470_v17, %v2469_v37  ;;  %v2485_v38 = vadd.f32 %v2484_v24, %v2483_v23  ;;  %v2528_v56 = vsel %vm1006_vm4, %v2462_v2, %v2527_v45  ;;  %v35_v37 = vld [vmem:[%s4677_s3 + $0x60] sm:$0xff]  ;;  %v36_v23 = vld [vmem:[%s4677_s3 + $0x68] sm:$0xff] }
 0x72d   :  { %v2353_v31 = vmul.f32 %v4445_v22, %v2305_v39  ;;  %v2354_v16 = vmul.f32 %v4443_v51, %v2306_v50  ;;  %v2478_v30 = vadd.f32 %v2477_v35, %v2476_v14  ;;  %v3327_v14 = vpack.c.bf16 %v36_v23, %v35_v37 }
 0x72e   :  { %v2486_v13 = vrot.slane %v2485_v38, 2  ;;  %v2529_v49 = vsel %vm1008_vm5, %v2471_v46, %v2528_v56  ;;  %v2642_v50 = vsub.s32 5, %v3616_v29  ;;  %v2648_v35 = vsub.s32 6, %v3616_v29 }
 0x72f   :  { %v2490_v41 = vsel %vm350_vm1, %v2353_v31, 0.0  ;;  %v2479_v43 = vrot.slane %v2478_v30, 1  ;;  %v2491_v36 = vsel %vm350_vm1, %v2354_v16, 0.0  ;;  %v2859_v23 = vsub.s32 7, %v3616_v29 }
 0x730   :  { %v2487_v58 = vadd.f32 %v2486_v13, %v2485_v38  ;;  %v2492_v59 = vadd.f32 %v2491_v36, %v2490_v41  ;;  %v2643_v46 = vrot.slane %v4600_v25, %v2642_v50  ;;  %v2649_v31 = vrot.slane %v4600_v25, %v2648_v35  ;;  %v37_v41 = vld [vmem:[%s4677_s3 + $0x70] sm:$0xff] }
 0x731   :  { %v2480_v47 = vadd.f32 %v2479_v43, %v2478_v30  ;;  %v38_v43 = vld [vmem:[%s4677_s3 + $0x78] sm:$0xff] }
 0x732   :  { %v2488_v19 = vrot.slane %v2487_v58, 1  ;;  %v2493_v20 = vrot.slane %v2492_v59, 4 }
 0x733   :  { %v2530_v21 = vsel %vm1010_vm6, %v2480_v47, %v2529_v49  ;;  %v39_v47 = vld [vmem:[%s4677_s3 + $0x80] sm:$0xff] }
 0x734   :  { %v2489_v0 = vadd.f32 %v2488_v19, %v2487_v58  ;;  %v2494_v22 = vadd.f32 %v2493_v20, %v2492_v59  ;;  %v3331_v59 = vpack.c.bf16 %v38_v43, %v37_v41  ;;  %v40_v19 = vld [vmem:[%s4677_s3 + $0x88] sm:$0xff] }
 0x735   :  { %v3335_v20 = vpack.c.bf16 %v40_v19, %v39_v47 }
 0x736   :  { %v2495_v42 = vrot.slane %v2494_v22, 2  ;;  %v2531_v51 = vsel %vm1012_vm7, %v2489_v0, %v2530_v21  ;;  %v41_v21 = vld [vmem:[%s4677_s3 + $0x90] sm:$0xff]  ;;  %v42_v0 = vld [vmem:[%s4677_s3 + $0x98] sm:$0xff] }
 0x738   :  { %v2496_v4 = vadd.f32 %v2495_v42, %v2494_v22  ;;  %v3339_v22 = vpack.c.bf16 %v42_v0, %v41_v21  ;;  %v2937_v42 = vld [vmem:[%s4678_s2 + $0x68] ss:$0 sm:$0xff] }
 0x73a   :  { %v2497_v26 = vrot.slane %v2496_v4, 1 }
 0x73c   :  { %v2498_v62 = vadd.f32 %v2497_v26, %v2496_v4 }
 0x73e   :  { %v2532_v40 = vsel %vm1014_vm8, %v2498_v62, %v2531_v51 }
 0x73f   :  { %3215 = vmatmul.mubr.msk.f32.vlgmr.msra.gmra.mrb[20].mxu1 %vm350_vm1, %v2532_v40 }
 0x812   :  { %v3216_v27 = vpop.f32.mrb[20].mxu1 }
 0x813   :  { %v2609_v6 = vadd.f32 %v3216_v27, %v2502_v63  ;;  %v2603_v1 = vpop.f32.mrb[21].mxu1 }
 0x814   :  { %v2604_v57 = vadd.f32 %v2603_v1, %v2502_v63  ;;  %v2746_v63 = vsub.s32 2, %v3616_v29 }
 0x815   :  { %v2613_v15 = vadd.f32 %v2609_v6, %v4006_v60 }
 0x816   :  { %v2612_v7 = vadd.f32 %v2604_v57, %v4002_v52  ;;  %v2652_v52 = vld [vmem:[%s4678_s2 + $0x48] sm:$0xff]  ;;  %v2747_v27 = vrot.slane %v4600_v25, %v2746_v63 }
 0x817   :  { %v2617_v28 = vsel %vm350_vm1, %v2613_v15, 0.0  ;;  %v3319_v12 = vpack.c.bf16 %v2653_v48, %v2652_v52 }
 0x818   :  { %2618 = vadd.xlane.f32.xlu1 %v2617_v28  ;;  %v2614_v8 = vsel %vm350_vm1, %v2612_v7, 0.0 }
 0x819   :  { %2615 = vadd.xlane.f32.xlu0 %v2614_v8  ;;  %3320 = vmatprep.subr.bf16.mxu1 %v3319_v12 }
 0x81a   :  { %3322 = vmatpush3.bf16.msra.mxu1 %v3319_v12 }
 0x81b   :  { %3324 = vmatprep.subr.bf16.mxu1 %v3323_v34 }
 0x81e   :  { %3326 = vmatpush3.bf16.msra.mxu1 %v3323_v34 }
 0x81f   :  { %3328 = vmatprep.subr.bf16.mxu1 %v3327_v14 }
 0x8a5   :  { %v2619_v9 = vpop.xlane.xlu1 %2618 }
 0x8a6   :  { %v2621_v3 = vmul.f32 0.03125, %v2619_v9  ;;  %v2616_v61 = vpop.xlane.xlu0 %2615 }
 0x8a7   :  { %v2620_v5 = vmul.f32 0.03125, %v2616_v61 }
 0x8a8   :  { %v2623_v53 = vsub.f32 %v2613_v15, %v2621_v3 }
 0x8a9   :  { %v2622_v44 = vsub.f32 %v2612_v7, %v2620_v5 }
 0x8aa   :  { %v2625_v10 = vmul.f32 %v2623_v53, %v2623_v53 }
 0x8ab   :  { %v2624_v54 = vmul.f32 %v2622_v44, %v2622_v44 }
 0x8ac   :  { %v2629_v60 = vsel %vm350_vm1, %v2625_v10, 0.0 }
 0x8ad   :  { %v2626_v11 = vsel %vm350_vm1, %v2624_v54, 0.0 }
 0x8ae   :  { %2627 = vadd.xlane.f32.xlu0 %v2626_v11 }
 0x8b2   :  { %2630 = vadd.xlane.f32.xlu0 %v2629_v60 }
 0x93b   :  { %v2628_v32 = vpop.xlane.xlu0 %2627 }
 0x93c   :  { %v2632_v2 = vmul.f32 0.03125, %v2628_v32 }
 0x93e   :  { %v2634_v17 = vadd.f32 1e-05, %v2632_v2 }
 0x93f   :  { %v2631_v24 = vpop.xlane.xlu0 %2630 }
 0x940   :  { %3511 = vrsqrt.f32 %v2634_v17  ;;  %v2633_v45 = vmul.f32 0.03125, %v2631_v24  ;;  %v2942_v24 = vld [vmem:[%s4677_s3 + $0xc8] ss:$0 sm:$0xff] }
 0x942   :  { %v2635_v39 = vadd.f32 1e-05, %v2633_v45 }
 0x944   :  { %3513 = vrsqrt.f32 %v2635_v39 }
 0x94a   :  { %v3512_v38 = vpop.eup %3511 }
 0x94b   :  { %v2638_v56 = vmul.f32 %v3512_v38, %v2622_v44 }
 0x94d   :  { %v2644_v16 = vmul.f32 %v2643_v46, %v2638_v56 }
 0x94e   :  { %v3514_v30 = vpop.eup %3513 }
 0x94f   :  { %v2639_v13 = vmul.f32 %v3514_v30, %v2623_v53  ;;  %v2650_v49 = vadd.f32 %v2649_v31, %v2644_v16 }
 0x951   :  { %v2645_v36 = vmul.f32 %v2643_v46, %v2639_v13  ;;  %3225 = vmatprep.mubr.msk.f32.mxu1 %vm350_vm1, %v2650_v49 }
 0x953   :  { %v2651_v58 = vadd.f32 %v2649_v31, %v2645_v36 }
 0x955   :  { %3226 = vmatmul.mubr.msk.f32.vlgmr.msra.gmra.mrb[22].mxu1 %vm350_vm1, %v2651_v58 }
 0x956   :  { %3330 = vmatpush3.bf16.msra.mxu1 %v3327_v14  ;;  %v2860_v14 = vrot.slane %v4600_v25, %v2859_v23 }
 0x957   :  { %3332 = vmatprep.subr.bf16.mxu1 %v3331_v59 }
 0x95a   :  { %3334 = vmatpush3.bf16.msra.mxu1 %v3331_v59 }
 0x95b   :  { %3336 = vmatprep.subr.bf16.mxu1 %v3335_v20 }
 0x95e   :  { %3338 = vmatpush3.bf16.msra.mxu1 %v3335_v20 }
 0x95f   :  { %3340 = vmatprep.subr.bf16.mxu1 %v3339_v22 }
 0x962   :  { %3342 = vmatpush3.bf16.msra.mxu1 %v3339_v22 }
 0xa28   :  { %v3227_v51 = vpop.f32.mrb[22].mxu1 }
 0xa29   :  { %v2739_v4 = vadd.f32 %v3227_v51, %v2937_v42  ;;  %v2733_v26 = vpop.f32.mrb[23].mxu1 }
 0xa2a   :  { %v2734_v62 = vadd.f32 %v2937_v42, %v2733_v26 }
 0xa2b   :  { %v2743_v33 = vmax.f32 %v2739_v4, 0.0 }
 0xa2c   :  { %v2742_v40 = vmax.f32 %v2734_v62, 0.0 }
 0xa2e   :  { %3244 = vmatprep.mubr.msk.f32.mxu1 %vm62_vm0, %v2742_v40 }
 0xa2f   :  { %3245 = vmatmul.mubr.msk.f32.vlgmr.msra.gmra.mrb[24].mxu1 %vm62_vm0, %v2743_v33 }
 0xb02   :  { %v3246_v6 = vpop.f32.mrb[24].mxu1 }
 0xb03   :  { %v2826_v1 = vadd.f32 %v3246_v6, %v2747_v27  ;;  %v2820_v57 = vpop.f32.mrb[25].mxu1 }
 0xb04   :  { %v2821_v15 = vadd.f32 %v2820_v57, %v2747_v27 }
 0xb05   :  { %v2830_v7 = vadd.f32 %v2826_v1, %v2651_v58 }
 0xb06   :  { %v2829_v28 = vadd.f32 %v2821_v15, %v2650_v49 }
 0xb07   :  { %v2834_v8 = vsel %vm350_vm1, %v2830_v7, 0.0 }
 0xb08   :  { %2835 = vadd.xlane.f32.xlu0 %v2834_v8  ;;  %v2831_v9 = vsel %vm350_vm1, %v2829_v28, 0.0 }
 0xb09   :  { %2832 = vadd.xlane.f32.xlu1 %v2831_v9 }
 0xb95   :  { %v2836_v3 = vpop.xlane.xlu0 %2835 }
 0xb96   :  { %v2838_v61 = vmul.f32 0.03125, %v2836_v3  ;;  %v2833_v5 = vpop.xlane.xlu1 %2832 }
 0xb97   :  { %v2837_v53 = vmul.f32 0.03125, %v2833_v5 }
 0xb98   :  { %v2840_v44 = vsub.f32 %v2830_v7, %v2838_v61 }
 0xb99   :  { %v2839_v54 = vsub.f32 %v2829_v28, %v2837_v53 }
 0xb9a   :  { %v2842_v11 = vmul.f32 %v2840_v44, %v2840_v44 }
 0xb9b   :  { %v2841_v10 = vmul.f32 %v2839_v54, %v2839_v54 }
 0xb9c   :  { %v2846_v60 = vsel %vm350_vm1, %v2842_v11, 0.0 }
 0xb9d   :  { %2847 = vadd.xlane.f32.xlu0 %v2846_v60  ;;  %v2843_v52 = vsel %vm350_vm1, %v2841_v10, 0.0 }
 0xb9e   :  { %2844 = vadd.xlane.f32.xlu1 %v2843_v52 }
 0xc2a   :  { %v2848_v48 = vpop.xlane.xlu0 %2847 }
 0xc2b   :  { %v2850_v18 = vmul.f32 0.03125, %v2848_v48  ;;  %v2845_v12 = vpop.xlane.xlu1 %2844 }
 0xc2c   :  { %v2849_v55 = vmul.f32 0.03125, %v2845_v12 }
 0xc2d   :  { %v2852_v34 = vadd.f32 1e-05, %v2850_v18 }
 0xc2e   :  { %v2851_v37 = vadd.f32 1e-05, %v2849_v55 }
 0xc2f   :  { %3515 = vrsqrt.f32 %v2852_v34 }
 0xc30   :  { %3517 = vrsqrt.f32 %v2851_v37 }
 0xc39   :  { %v3516_v32 = vpop.eup %3515 }
 0xc3a   :  { %v3518_v2 = vpop.eup %3517  ;;  %v2856_v17 = vmul.f32 %v3516_v32, %v2840_v44 }
 0xc3b   :  { %v2855_v45 = vmul.f32 %v3518_v2, %v2839_v54 }
 0xc3c   :  { %v2862_v39 = vmul.f32 %v2860_v14, %v2856_v17 }
 0xc3d   :  { %v2861_v50 = vmul.f32 %v2860_v14, %v2855_v45 }
 0xc3e   :  { %v2868_v35 = vadd.f32 %v2942_v24, %v2862_v39 }
 0xc3f   :  { %v2867_v46 = vadd.f32 %v2942_v24, %v2861_v50 }
 0xc40   :  { %2870 = vst.msk [vmem:[%s4679_s4 + $0x8] sm:$0xff] %vm350_vm1, %v2868_v35 }
 0xc41   :  { %2869 = vst.msk [vmem:[%s4679_s4] sm:$0xff] %vm350_vm1, %v2867_v46 }

</bundles_post_ra>
